<compile_context>
chip_gen: v7x
topology: tpu7x:2x2x1
jax: 0.10.0
libtpu: 0.0.40
codegen_flags: <defaults>
</compile_context>

<pallas_src>
import functools

import jax
import jax.numpy as jnp
from jax.experimental import pallas as pl
from jax.experimental.pallas import tpu as pltpu

_LANE = 128
_WIDTHS = (4096, 2048, 1024, 512, 256, 128)   # candidate lane-dense widths
_BLOCK_BYTES = 6 * 1024 * 1024                # per-buffer block footprint budget
_VMEM_LIMIT_BYTES = 40 << 20                  # explicit scoped-VMEM limit
_SMALL_BYTES = 512 * 1024                     # below this: plain-jnp fast path


def _nonneg_kernel(x_ref, o_ref, *, bound, eps2):
    # Compute in f32 (matches the f32 buffers of the torch module; also keeps
    # v5e's no-bf16 VPU path clean for bf16 inputs).
    x = x_ref[...].astype(jnp.float32)
    y = jnp.maximum(x, bound)
    o_ref[...] = (y * y - eps2).astype(o_ref.dtype)


def _nonneg_jnp(x: jax.Array, bound: float, eps2: float) -> jax.Array:
    y = jnp.maximum(x.astype(jnp.float32), jnp.float32(bound))
    return (y * y - jnp.float32(eps2)).astype(x.dtype)


def _round_up(a: int, b: int) -> int:
    return -(-a // b) * b


def _choose_tile_rows(m: int, row_bytes: int) -> int:
    """Pick a row-tile (multiple of 8) under the byte budget with >=2, and
    preferably an even number of, grid steps (v7x: balance both TensorCores)."""
    if m <= 8:
        return m
    budget = max(8, (_BLOCK_BYTES // row_bytes) // 8 * 8)
    if m <= budget:
        # Whole tensor would fit one block: still split into (at least) 2 even
        # grid steps so the "parallel" axis shards across both v7x TCs.
        return min(_round_up(-(-m // 2), 8), m)
    # m > budget: largest tile <= budget that yields an even step count.
    # Parity flips quickly, so the scan stays close to the budget (flat region
    # of the mem-bound tile curve -> negligible bandwidth cost).
    tile = budget
    for cand in range(budget, max(8, budget - 64 * 8) - 1, -8):
        if -(-m // cand) % 2 == 0:
            tile = cand
            break
    return tile


def _nonneg_forward(x: jax.Array, bound: float, eps2: float,
                    *, donate: bool = False) -> jax.Array:
    orig_shape = x.shape
    dtype = x.dtype
    n = int(x.size)
    itemsize = jnp.dtype(dtype).itemsize
    nbytes = n * itemsize

    # Fast paths (per perf review):
    #  * tiny tensors (the common case for this module): pallas_call launch
    #    overhead dwarfs the work; XLA fuses the elementwise expression.
    #  * sizes not a multiple of 128 lanes: avoiding extra pad/slice/concat
    #    HBM passes beats any standalone kernel on these rare shapes.
    if n == 0 or nbytes < _SMALL_BYTES or n % _LANE != 0:
        return _nonneg_jnp(x, bound, eps2)

    flat = x.reshape(-1)

    # Widest lane-dense column count that divides n.
    w = _LANE
    for cand in _WIDTHS:
        if n % cand == 0:
            w = cand
            break
    m = n // w

    tile_m = _choose_tile_rows(m, w * itemsize)
    grid = (pl.cdiv(m, tile_m),)   # ragged last row-block is handled by masking

    kernel = functools.partial(_nonneg_kernel, bound=bound, eps2=eps2)

    out2d = pl.pallas_call(
        kernel,
        out_shape=jax.ShapeDtypeStruct((m, w), dtype),
        grid_spec=pltpu.PrefetchScalarGridSpec(
            num_scalar_prefetch=0,
            grid=grid,
            in_specs=[pl.BlockSpec((tile_m, w), lambda i: (i, 0))],
            out_specs=pl.BlockSpec((tile_m, w), lambda i: (i, 0)),
        ),
        compiler_params=pltpu.CompilerParams(
            dimension_semantics=("parallel",),
            vmem_limit_bytes=_VMEM_LIMIT_BYTES,
        ),
        input_output_aliases=({0: 0} if donate else {}),
    )(flat.reshape(m, w))

    return out2d.reshape(orig_shape)


class NonNegativeParametrizer:
    """JAX/Pallas mirror of the PyTorch module (forward only)."""

    def __init__(self, minimum: float = 0.0, eps: float = 1e-6):
        minimum = float(minimum)
        eps = float(eps)
        # torch buffer `eps` stores eps**2
        self.eps2 = eps * eps
        # LowerBound bound = sqrt(minimum + eps**2)
        self.bound = (minimum + self.eps2) ** 0.5

    def init(self, x: jax.Array) -> jax.Array:
        # torch.sqrt(torch.max(x + eps2, eps2)) -- plain JAX (init helper only).
        return jnp.sqrt(jnp.maximum(x + self.eps2, self.eps2))

    def __call__(self, x: jax.Array, *, donate: bool = False) -> jax.Array:
        # TODO(synk): LowerBound's custom backward (straight-through toward the
        # bound) is a gradient-only behavior; forward pass only is implemented.
        return _nonneg_forward(x, self.bound, self.eps2, donate=donate)


def _reference(x: jax.Array, bound: float, eps2: float) -> jax.Array:
    return _nonneg_jnp(x, bound, eps2)


if __name__ == "__main__":
    module = NonNegativeParametrizer()
    key = jax.random.PRNGKey(0)
    k1, k2, k3, k4, k5 = jax.random.split(key, 5)

    # 1) Typical small per-channel-parameter style input -> jnp fast path.
    x1 = jax.random.normal(k1, (2, 4, 16, 16), dtype=jnp.float32)
    y1 = jax.block_until_ready(module(x1))
    assert y1.shape == x1.shape and y1.dtype == x1.dtype
    assert jnp.allclose(y1, _reference(x1, module.bound, module.eps2),
                        atol=1e-6, rtol=1e-6), "mismatch (fast path)"

    # 2) Larger feature-map-sized input -> Pallas path (w=4096, 2 even grid steps).
    x2 = jax.random.normal(k2, (2, 192, 32, 32), dtype=jnp.float32)
    y2 = jax.block_until_ready(module(x2))
    assert y2.shape == x2.shape and y2.dtype == x2.dtype
    assert jnp.allclose(y2, _reference(x2, module.bound, module.eps2),
                        atol=1e-6, rtol=1e-6), "mismatch (pallas path)"

    # 3) Pallas path with a ragged last row-block (m=104, tile_m=56).
    x3 = jax.random.normal(k3, (104, 64, 64), dtype=jnp.float32)
    y3 = jax.block_until_ready(module(x3))
    assert y3.shape == x3.shape and y3.dtype == x3.dtype
    assert jnp.allclose(y3, _reference(x3, module.bound, module.eps2),
                        atol=1e-6, rtol=1e-6), "mismatch (ragged block)"

    # 4) bf16 input through the Pallas path (f32 compute, cast on store).
    x4 = jax.random.normal(k4, (2, 192, 32, 32), dtype=jnp.bfloat16)
    y4 = jax.block_until_ready(module(x4))
    assert y4.shape == x4.shape and y4.dtype == x4.dtype
    assert jnp.allclose(y4.astype(jnp.float32),
                        _reference(x4, module.bound, module.eps2).astype(jnp.float32),
                        atol=1e-2, rtol=1e-2), "mismatch (bf16)"

    # 5) Odd total element count (not a multiple of 128) -> fused jnp fallback.
    x5 = jax.random.normal(k5, (3, 5, 7, 11), dtype=jnp.float32)
    y5 = jax.block_until_ready(module(x5))
    assert y5.shape == x5.shape and y5.dtype == x5.dtype
    assert jnp.allclose(y5, _reference(x5, module.bound, module.eps2),
                        atol=1e-6, rtol=1e-6), "mismatch (odd shape)"

    print("KERNEL_OK")
</pallas_src>

<mosaic_0001>
module attributes {stable_mosaic.version = 11 : i64} {
  func.func @_nonneg_kernel(%arg0: i32, %arg1: memref<48x4096xf32, #tpu.memory_space<vmem>>, %arg2: memref<48x4096xf32, #tpu.memory_space<vmem>>) attributes {dimension_semantics = [#tpu.dimension_semantics<parallel>], iteration_bounds = array<i64: 2>, scalar_prefetch = 0 : i64, scratch_operands = 0 : i64, tpu.core_type = #tpu.core_type<tc>, window_params = [{transform_indices = @transform_0, window_bounds = array<i64: 48, 4096>}, {transform_indices = @transform_1, window_bounds = array<i64: 48, 4096>}]} {
    %c0 = arith.constant 0 : index
    %c0_0 = arith.constant 0 : index
    %0 = vector.load %arg1[%c0, %c0_0] : memref<48x4096xf32, #tpu.memory_space<vmem>>, vector<48x4096xf32>
    %cst = arith.constant 9.99999997E-7 : f32
    %1 = vector.broadcast %cst : f32 to vector<48x4096xf32>
    %2 = arith.maximumf %0, %1 : vector<48x4096xf32>
    %3 = arith.mulf %2, %2 : vector<48x4096xf32>
    %cst_1 = arith.constant 9.99999996E-13 : f32
    %4 = vector.broadcast %cst_1 : f32 to vector<48x4096xf32>
    %5 = arith.subf %3, %4 : vector<48x4096xf32>
    %c0_2 = arith.constant 0 : index
    %c0_3 = arith.constant 0 : index
    %6 = vector.load %arg2[%c0_2, %c0_3] : memref<48x4096xf32, #tpu.memory_space<vmem>>, vector<48x4096xf32>
    tpu.vector_store %arg2[%c0_2, %c0_3], %5 {strides = array<i32>} : memref<48x4096xf32, #tpu.memory_space<vmem>>, vector<48x4096xf32>,
    return
  }
  func.func @transform_0(%arg0: i32) -> (i32, i32) {
    %c0_i32 = arith.constant 0 : i32
    %c0_i32_0 = arith.constant 0 : i32
    return %arg0, %c0_i32 : i32, i32
  }
  func.func @transform_1(%arg0: i32) -> (i32, i32) {
    %c0_i32 = arith.constant 0 : i32
    %c0_i32_0 = arith.constant 0 : i32
    return %arg0, %c0_i32 : i32, i32
  }
}

</mosaic_0001>

<bundles_post_ra>
// kernel: tpu_custom_call.1
= control target key start
LH: loop header
LB: loop body
LE: loop exit
PB: predicated region body
PF: predicated region fallthrough
CT: control target
= control target key end

     0   :  { %6 = vsyncpa [#allocation3], 0  ;;  %s2109_s0 = inlined_call_operand.hbm [shape: f32[96,4096], index: 0, kind: input, shape index: {}]   ;;  %s2110_s1 = inlined_call_operand.hbm [shape: f32[96,4096], index: 1, kind: output, shape index: {}]  }
   0x1   :  { %8 = vsyncpa [#allocation3 + $0x1], 0 }
   0x2   :  { %9 = vsyncpa [#allocation4], 0 }
   0x3   :  { %11 = vsyncpa [#allocation4 + $0x1], 0  ;;  %s1560_s6 = smov 0   ;;  %s1562_s7 = smov 0  }
   0x4   :  { %s1564_s8 = smov 0   ;;  %s1566_s9 = smov 0  }
   0x5 LB: > { %s1581_s10 = sadd.s32 4294967295, %s1542_s9   ;;  %s1186_s11 = sadd.s32 4294967294, %s1542_s9   ;;  %s1542_s9 = sphi %s1566_s9, %s2122_s9   ;;  %s1538_s8 = sphi %s1564_s8, %s2121_s8   ;;  %s1534_s7 = sphi %s1562_s7, %s2120_s7   ;;  %s1530_s6 = sphi %s1560_s6, %s2119_s6  }
   0x6   : > { %s1585_s12 = sadd.s32 1, %s1542_s9   ;;  %s24_s13 = sadd.s32 1, %s1538_s8 }
   0x7   : > { %s21_s14 = ssub.s32 %s1542_s9, %s1585_s12  ;;  %p31_p0 = scmp.ne.s32.totalorder %s1538_s8, %s1534_s7 }
   0x8   : > { %p22_p1 = scmp.eq.s32.totalorder %s21_s14, 0  ;;  %p32_p2 = scmp.eq.s32.totalorder %s1542_s9, 0 }
   0x9   : > { %p37_p3 = scmp.ne.s32.totalorder %s1534_s7, %s1530_s6  ;;  %p38_p4 = scmp.eq.s32.totalorder %s1581_s10, 0 }
   0xa   : > { %s1597_s15 = scalar_select %p22_p1, %s1538_s8, %s24_s13  }
   0xb   : > { %p33_p5 = por %p32_p2, %p31_p0  ;;  %p1599_p6 = por %p38_p4, %p37_p3 }
   0xc   : > { %p61_p7 = scmp.eq.s32.totalorder %s1581_s10, 1  ;;  %p67_p8 = scmp.eq.s32.totalorder %s1186_s11, 1 }
   0xd   : > { %p1408_p10 = scmp.lt.s32.totalorder %s1542_s9, 2  ;;  %s87_s19 = sand.u32 1, %s1538_s8  }
   0xe   : > { %p1606_p11 = por %p61_p7, %p31_p0  ;;  %p1610_p12 = por %p67_p8, %p37_p3 }
   0xf   : > { %s1392_s20 = smul.u32 24576, %s1542_s9  ;;  %p1621_p13 = pnand %p1408_p10, %p33_p5 }
  0x10   : > { %s2113_s17 = scalar_select %p1606_p11, 1, 0 }
  0x11   : > { %s2114_s18 = scalar_select %p1610_p12, 1, 0 }
  0x12   : > { %s1394_s21 = smul.u32 1536, %s87_s19  ;;  %s1619_s24 = scalar_lea.hbm %s2109_s0, %s1392_s20 }
  0x13   : > { %s1627_s28 = scalar_lea.sflag [#allocation3], %s87_s19  ;;  %s1446_s29 = scalar_lea.hbm %s1619_s24, 24576 }
  0x14   : > { %s91_s26 = scalar_lea.vmem [#allocation2], %s1394_s21  ;;  %p1447_p0 = scmp.ne.s32.totalorder %s1619_s24, %s1446_s29 }
  0x15   : > { %s99_s27 = sshll.u32 %s91_s26, 4  ;;  %p1448_p1 = pneg %p1621_p13  ;;  %s1625_s27 = int_to_ptr.vmem [resolvable:$true] %s99_s27 }
  0x16   : > { %s1451_s3 = scalar_lea.hbm %s2109_s0, 49152  ;;  %p1452_p4 = scmp.lt.u32.totalorder %s1619_s24, %s2109_s0 }
  0x17   : > { %p1449_p2 = pnand %p1448_p1, %p1447_p0  ;;  %p1453_p5 = scmp.lt.u32.totalorder %s1451_s3, %s1446_s29 }
  0x18   : > { %p1455_p8 = scmp.lt.u32.totalorder %s1446_s29, %s1619_s24 }
  0x19   : > { %p1450_p3 = pneg %p1449_p2  ;;  %p1454_p7 = por %p1453_p5, %p1452_p4 }
  0x1b   : > { %p1456_p10 = por %p1455_p8, %p1454_p7 }
  0x1d   : > { %p1457_p9 = pnand %p1456_p10, %p1450_p3 }
  0x1f   : > { %1460 = shalt.err (!%p1457_p9)
}
  0x20   : > { %s1461_s11 = scalar_lea.vmem %s1625_s27, 24576  ;;  %s1544_s13 = smov [#allocation2]  }
  0x21   : > { %p1462_p0 = scmp.ne.s32.totalorder %s1625_s27, %s1461_s11  ;;  %s1466_s14 = sshll.u32 %s1544_s13, 4  ;;  %s1467_s14 = int_to_ptr.vmem [resolvable:$false] %s1466_s14 }
  0x22   : > { %s1468_s19 = scalar_lea.vmem %s1467_s14, 49152  ;;  %p1469_p11 = scmp.lt.s32.totalorder %s1625_s27, %s1467_s14 }
  0x23   : > { %p1464_p2 = pnand %p1462_p0, %p1448_p1  ;;  %p1470_p4 = scmp.lt.s32.totalorder %s1468_s19, %s1461_s11 }
  0x25   : > { %p1465_p12 = pneg %p1464_p2  ;;  %p1471_p5 = por %p1470_p4, %p1469_p11 }
  0x27   : > { %p1472_p7 = pnand %p1471_p5, %p1465_p12 }
  0x29   : > { %1475 = shalt.err (!%p1472_p7)
}
  0x2a   : > { %s1545_s20 = smov 4096   ;;  %s1546_s21 = smov 256  }
  0x2b   : > { %1403 = dma.hbm_to_vmem [thread:$0]  (!%p1621_p13), %s1619_s24, 24576, %s1625_s27, %s1627_s28, %s1545_s20, %s1545_s20, %s1546_s21  }
  0x2c   : > { %p1191_p9 = scmp.ge.s32.totalorder %s1542_s9, 1  ;;  %p107_p1 = scmp.lt.s32.totalorder %s1542_s9, 3 }
  0x2e   : > { %p108_p3 = pnand %p1191_p9, %p107_p1 }
  0x2f   : > { %s1658_s22 = sand.u32 (!%p108_p3), 1, %s1534_s7  }
  0x30   : > { %111 = sbr.rel (%p108_p3) target bundleno = 267 (0x10b), region = 24  ;;  %s114_s26 = scalar_lea.sflag (!%p108_p3), [#allocation3], %s1658_s22 }
  0x31   : > { %s1395_s23 = smul.u32 (!%p108_p3), 1536, %s1658_s22 }
  0x33   : > { %s1664_s29 = scalar_lea.vmem (!%p108_p3), [#allocation2], %s1395_s23 }
  0x37   : > { %1521 = dma.done.wait (%p1599_p6), %s114_s26, 24576  }
  0x38   : > { %1523 = vsyncadd (%p1599_p6), %s114_s26, 4294942720  ;;  %v138_v0 = vld [vmem:[%s1664_s29] sm:$0xff]  ;;  %v139_v1 = vld [vmem:[%s1664_s29 + $0x8] sm:$0xff]  ;;  %s1684_s16 = scalar_lea.vmem [#allocation5], %s1395_s23  ;;  %s1393_s24 = smul.u32 24576, %s1581_s10 }
  0x39   : > { %v140_v2 = vld [vmem:[%s1664_s29 + $0x10] sm:$0xff]  ;;  %v330_v3 = vmax.f32 %v138_v0, 1e-06  ;;  %v331_v4 = vmax.f32 %v139_v1, 1e-06  ;;  %v141_v6 = vld [vmem:[%s1664_s29 + $0x18] sm:$0xff] }
  0x3a   : > { %v332_v5 = vmax.f32 %v140_v2, 1e-06  ;;  %v142_v7 = vld [vmem:[%s1664_s29 + $0x20] sm:$0xff]  ;;  %v143_v8 = vld [vmem:[%s1664_s29 + $0x28] sm:$0xff]  ;;  %v333_v12 = vmax.f32 %v141_v6, 1e-06  ;;  %s2059_s28 = scalar_lea.hbm %s2110_s1, %s1393_s24 }
  0x3b   : > { %v522_v9 = vmul.f32 %v330_v3, %v330_v3  ;;  %v523_v10 = vmul.f32 %v331_v4, %v331_v4  ;;  %v144_v13 = vld [vmem:[%s1664_s29 + $0x30] sm:$0xff]  ;;  %v145_v14 = vld [vmem:[%s1664_s29 + $0x38] sm:$0xff]  ;;  %v146_v15 = vld [vmem:[%s1664_s29 + $0x40] sm:$0xff]  ;;  %v334_v16 = vmax.f32 %v142_v7, 1e-06  ;;  %s1113_s10 = sshll.u32 %s1684_s16, 4  ;;  %s2063_s10 = int_to_ptr.vmem [resolvable:$true] %s1113_s10 }
  0x3c   : > { %v524_v11 = vmul.f32 %v332_v5, %v332_v5  ;;  %v335_v17 = vmax.f32 %v143_v8, 1e-06  ;;  %v336_v18 = vmax.f32 %v144_v13, 1e-06  ;;  %v525_v22 = vmul.f32 %v333_v12, %v333_v12  ;;  %v147_v27 = vld [vmem:[%s1664_s29 + $0x48] sm:$0xff]  ;;  %v148_v28 = vld [vmem:[%s1664_s29 + $0x50] sm:$0xff] }
  0x3d   : > { %v1192_v19 = vadd.f32 -1e-12, %v522_v9  ;;  %v1193_v20 = vadd.f32 -1e-12, %v523_v10  ;;  %v526_v23 = vmul.f32 %v334_v16, %v334_v16  ;;  %v337_v26 = vmax.f32 %v145_v14, 1e-06 }
  0x3e   : > { %v1194_v21 = vadd.f32 -1e-12, %v524_v11  ;;  %v527_v24 = vmul.f32 %v335_v17, %v335_v17  ;;  %v528_v25 = vmul.f32 %v336_v18, %v336_v18  ;;  %v149_v29 = vld [vmem:[%s1664_s29 + $0x58] sm:$0xff]  ;;  %v1195_v30 = vadd.f32 -1e-12, %v525_v22  ;;  %v150_v41 = vld [vmem:[%s1664_s29 + $0x60] sm:$0xff] }
  0x3f   : > { %906 = vst [vmem:[%s1684_s16] sm:$0xff] %v1192_v19  ;;  %907 = vst [vmem:[%s1684_s16 + $0x8] sm:$0xff] %v1193_v20  ;;  %v338_v31 = vmax.f32 %v146_v15, 1e-06  ;;  %v339_v32 = vmax.f32 %v147_v27, 1e-06  ;;  %v529_v36 = vmul.f32 %v337_v26, %v337_v26  ;;  %v151_v42 = vld [vmem:[%s1664_s29 + $0x68] sm:$0xff] }
  0x40   : > { %908 = vst [vmem:[%s1684_s16 + $0x10] sm:$0xff] %v1194_v21  ;;  %v1196_v33 = vadd.f32 -1e-12, %v526_v23  ;;  %v1197_v34 = vadd.f32 -1e-12, %v527_v24  ;;  %909 = vst [vmem:[%s1684_s16 + $0x18] sm:$0xff] %v1195_v30 }
  0x41   : > { %v1198_v35 = vadd.f32 -1e-12, %v528_v25  ;;  %v530_v37 = vmul.f32 %v338_v31, %v338_v31  ;;  %v531_v38 = vmul.f32 %v339_v32, %v339_v32  ;;  %v340_v39 = vmax.f32 %v148_v28, 1e-06  ;;  %v152_v50 = vld [vmem:[%s1664_s29 + $0x70] sm:$0xff]  ;;  %v153_v51 = vld [vmem:[%s1664_s29 + $0x78] sm:$0xff] }
  0x42   : > { %v341_v40 = vmax.f32 %v149_v29, 1e-06  ;;  %910 = vst [vmem:[%s1684_s16 + $0x20] sm:$0xff] %v1196_v33  ;;  %911 = vst [vmem:[%s1684_s16 + $0x28] sm:$0xff] %v1197_v34  ;;  %v1199_v43 = vadd.f32 -1e-12, %v529_v36 }
  0x43   : > { %912 = vst [vmem:[%s1684_s16 + $0x30] sm:$0xff] %v1198_v35  ;;  %v342_v44 = vmax.f32 %v150_v41, 1e-06  ;;  %v343_v45 = vmax.f32 %v151_v42, 1e-06  ;;  %v532_v48 = vmul.f32 %v340_v39, %v340_v39  ;;  %v154_v56 = vld [vmem:[%s1664_s29 + $0x80] sm:$0xff] }
  0x44   : > { %v1200_v46 = vadd.f32 -1e-12, %v530_v37  ;;  %v1201_v47 = vadd.f32 -1e-12, %v531_v38  ;;  %v533_v49 = vmul.f32 %v341_v40, %v341_v40  ;;  %913 = vst [vmem:[%s1684_s16 + $0x38] sm:$0xff] %v1199_v43  ;;  %v155_v57 = vld [vmem:[%s1664_s29 + $0x88] sm:$0xff] }
  0x45   : > { %v534_v52 = vmul.f32 %v342_v44, %v342_v44  ;;  %v535_v53 = vmul.f32 %v343_v45, %v343_v45  ;;  %v344_v54 = vmax.f32 %v152_v50, 1e-06  ;;  %v345_v55 = vmax.f32 %v153_v51, 1e-06  ;;  %v156_v1 = vld [vmem:[%s1664_s29 + $0x90] sm:$0xff]  ;;  %v157_v2 = vld [vmem:[%s1664_s29 + $0x98] sm:$0xff] }
  0x46   : > { %914 = vst [vmem:[%s1684_s16 + $0x40] sm:$0xff] %v1200_v46  ;;  %915 = vst [vmem:[%s1684_s16 + $0x48] sm:$0xff] %v1201_v47  ;;  %v1202_v58 = vadd.f32 -1e-12, %v532_v48  ;;  %v1203_v59 = vadd.f32 -1e-12, %v533_v49 }
  0x47   : > { %v346_v60 = vmax.f32 %v154_v56, 1e-06  ;;  %v1204_v61 = vadd.f32 -1e-12, %v534_v52  ;;  %v1205_v62 = vadd.f32 -1e-12, %v535_v53  ;;  %v536_v63 = vmul.f32 %v344_v54, %v344_v54 }
  0x48   : > { %v537_v0 = vmul.f32 %v345_v55, %v345_v55  ;;  %916 = vst [vmem:[%s1684_s16 + $0x50] sm:$0xff] %v1202_v58  ;;  %917 = vst [vmem:[%s1684_s16 + $0x58] sm:$0xff] %v1203_v59  ;;  %v347_v4 = vmax.f32 %v155_v57, 1e-06  ;;  %v348_v5 = vmax.f32 %v156_v1, 1e-06 }
  0x49   : > { %v538_v3 = vmul.f32 %v346_v60, %v346_v60  ;;  %v349_v6 = vmax.f32 %v157_v2, 1e-06  ;;  %918 = vst [vmem:[%s1684_s16 + $0x60] sm:$0xff] %v1204_v61  ;;  %919 = vst [vmem:[%s1684_s16 + $0x68] sm:$0xff] %v1205_v62  ;;  %v1206_v7 = vadd.f32 -1e-12, %v536_v63 }
  0x4a   : > { %v1207_v8 = vadd.f32 -1e-12, %v537_v0  ;;  %v158_v9 = vld [vmem:[%s1664_s29 + $0xa0] sm:$0xff]  ;;  %v159_v10 = vld [vmem:[%s1664_s29 + $0xa8] sm:$0xff]  ;;  %v539_v12 = vmul.f32 %v347_v4, %v347_v4  ;;  %v540_v13 = vmul.f32 %v348_v5, %v348_v5  ;;  %v160_v15 = vld [vmem:[%s1664_s29 + $0xb0] sm:$0xff]  ;;  %s1099_s30 = scalar_lea.sflag [#allocation4], %s1658_s22 }
  0x4b   : > { %v1208_v11 = vadd.f32 -1e-12, %v538_v3  ;;  %v541_v14 = vmul.f32 %v349_v6, %v349_v6  ;;  %v161_v16 = vld [vmem:[%s1664_s29 + $0xb8] sm:$0xff]  ;;  %v162_v17 = vld [vmem:[%s1664_s29 + $0xc0] sm:$0xff]  ;;  %920 = vst [vmem:[%s1684_s16 + $0x70] sm:$0xff] %v1206_v7  ;;  %v163_v28 = vld [vmem:[%s1664_s29 + $0xc8] sm:$0xff] }
  0x4c   : > { %921 = vst [vmem:[%s1684_s16 + $0x78] sm:$0xff] %v1207_v8  ;;  %v350_v18 = vmax.f32 %v158_v9, 1e-06  ;;  %v351_v19 = vmax.f32 %v159_v10, 1e-06  ;;  %v164_v29 = vld [vmem:[%s1664_s29 + $0xd0] sm:$0xff] }
  0x4d   : > { %v352_v20 = vmax.f32 %v160_v15, 1e-06  ;;  %922 = vst [vmem:[%s1684_s16 + $0x80] sm:$0xff] %v1208_v11  ;;  %v1209_v21 = vadd.f32 -1e-12, %v539_v12  ;;  %v165_v30 = vld [vmem:[%s1664_s29 + $0xd8] sm:$0xff] }
  0x4e   : > { %v1210_v22 = vadd.f32 -1e-12, %v540_v13  ;;  %v1211_v23 = vadd.f32 -1e-12, %v541_v14  ;;  %v542_v24 = vmul.f32 %v350_v18, %v350_v18  ;;  %v543_v25 = vmul.f32 %v351_v19, %v351_v19  ;;  %v166_v42 = vld [vmem:[%s1664_s29 + $0xe0] sm:$0xff]  ;;  %v167_v43 = vld [vmem:[%s1664_s29 + $0xe8] sm:$0xff] }
  0x4f   : > { %v544_v26 = vmul.f32 %v352_v20, %v352_v20  ;;  %v353_v27 = vmax.f32 %v161_v16, 1e-06  ;;  %923 = vst [vmem:[%s1684_s16 + $0x88] sm:$0xff] %v1209_v21  ;;  %v354_v31 = vmax.f32 %v162_v17, 1e-06  ;;  %v168_v44 = vld [vmem:[%s1664_s29 + $0xf0] sm:$0xff] }
  0x50   : > { %924 = vst [vmem:[%s1684_s16 + $0x90] sm:$0xff] %v1210_v22  ;;  %925 = vst [vmem:[%s1684_s16 + $0x98] sm:$0xff] %v1211_v23  ;;  %v355_v32 = vmax.f32 %v163_v28, 1e-06  ;;  %v356_v33 = vmax.f32 %v164_v29, 1e-06 }
  0x51   : > { %v1212_v34 = vadd.f32 -1e-12, %v542_v24  ;;  %v1213_v35 = vadd.f32 -1e-12, %v543_v25  ;;  %v1214_v36 = vadd.f32 -1e-12, %v544_v26  ;;  %v545_v37 = vmul.f32 %v353_v27, %v353_v27 }
  0x52   : > { %v546_v38 = vmul.f32 %v354_v31, %v354_v31  ;;  %v547_v39 = vmul.f32 %v355_v32, %v355_v32  ;;  %v548_v40 = vmul.f32 %v356_v33, %v356_v33  ;;  %v357_v41 = vmax.f32 %v165_v30, 1e-06  ;;  %v169_v55 = vld [vmem:[%s1664_s29 + $0xf8] sm:$0xff]  ;;  %v170_v56 = vld [vmem:[%s1664_s29 + $0x100] sm:$0xff]  ;;  %v171_v57 = vld [vmem:[%s1664_s29 + $0x108] sm:$0xff]  ;;  %s1476_s2 = scalar_lea.vmem %s2063_s10, 24576 }
  0x53   : > { %926 = vst [vmem:[%s1684_s16 + $0xa0] sm:$0xff] %v1212_v34  ;;  %927 = vst [vmem:[%s1684_s16 + $0xa8] sm:$0xff] %v1213_v35  ;;  %v1215_v45 = vadd.f32 -1e-12, %v545_v37  ;;  %v358_v46 = vmax.f32 %v166_v42, 1e-06  ;;  %p1477_p6 = scmp.ne.s32.totalorder %s2063_s10, %s1476_s2 }
  0x54   : > { %928 = vst [vmem:[%s1684_s16 + $0xb0] sm:$0xff] %v1214_v36  ;;  %v359_v47 = vmax.f32 %v167_v43, 1e-06  ;;  %v1216_v48 = vadd.f32 -1e-12, %v546_v38  ;;  %v549_v51 = vmul.f32 %v357_v41, %v357_v41  ;;  %v172_v3 = vld [vmem:[%s1664_s29 + $0x110] sm:$0xff] }
  0x55   : > { %v1217_v49 = vadd.f32 -1e-12, %v547_v39  ;;  %v1218_v50 = vadd.f32 -1e-12, %v548_v40  ;;  %929 = vst [vmem:[%s1684_s16 + $0xb8] sm:$0xff] %v1215_v45  ;;  %v550_v52 = vmul.f32 %v358_v46, %v358_v46  ;;  %v173_v4 = vld [vmem:[%s1664_s29 + $0x118] sm:$0xff] }
  0x56   : > { %v551_v53 = vmul.f32 %v359_v47, %v359_v47  ;;  %v360_v54 = vmax.f32 %v168_v44, 1e-06  ;;  %930 = vst [vmem:[%s1684_s16 + $0xc0] sm:$0xff] %v1216_v48  ;;  %v1219_v58 = vadd.f32 -1e-12, %v549_v51  ;;  %v174_v5 = vld [vmem:[%s1664_s29 + $0x120] sm:$0xff] }
  0x57   : > { %931 = vst [vmem:[%s1684_s16 + $0xc8] sm:$0xff] %v1217_v49  ;;  %932 = vst [vmem:[%s1684_s16 + $0xd0] sm:$0xff] %v1218_v50  ;;  %v361_v59 = vmax.f32 %v169_v55, 1e-06  ;;  %v362_v60 = vmax.f32 %v170_v56, 1e-06 }
  0x58   : > { %v1220_v61 = vadd.f32 -1e-12, %v550_v52  ;;  %v1221_v62 = vadd.f32 -1e-12, %v551_v53  ;;  %v552_v63 = vmul.f32 %v360_v54, %v360_v54  ;;  %v363_v0 = vmax.f32 %v171_v57, 1e-06 }
  0x59   : > { %933 = vst [vmem:[%s1684_s16 + $0xd8] sm:$0xff] %v1219_v58  ;;  %v553_v1 = vmul.f32 %v361_v59, %v361_v59  ;;  %v554_v2 = vmul.f32 %v362_v60, %v362_v60  ;;  %v364_v8 = vmax.f32 %v172_v3, 1e-06  ;;  %v365_v9 = vmax.f32 %v173_v4, 1e-06  ;;  %v175_v16 = vld [vmem:[%s1664_s29 + $0x128] sm:$0xff] }
  0x5a   : > { %934 = vst [vmem:[%s1684_s16 + $0xe0] sm:$0xff] %v1220_v61  ;;  %935 = vst [vmem:[%s1684_s16 + $0xe8] sm:$0xff] %v1221_v62  ;;  %v1222_v6 = vadd.f32 -1e-12, %v552_v63  ;;  %v555_v7 = vmul.f32 %v363_v0, %v363_v0  ;;  %v366_v12 = vmax.f32 %v174_v5, 1e-06 }
  0x5b   : > { %v1223_v10 = vadd.f32 -1e-12, %v553_v1  ;;  %v1224_v11 = vadd.f32 -1e-12, %v554_v2  ;;  %v556_v14 = vmul.f32 %v364_v8, %v364_v8  ;;  %v557_v15 = vmul.f32 %v365_v9, %v365_v9  ;;  %v176_v17 = vld [vmem:[%s1664_s29 + $0x130] sm:$0xff]  ;;  %v177_v18 = vld [vmem:[%s1664_s29 + $0x138] sm:$0xff] }
  0x5c   : > { %936 = vst [vmem:[%s1684_s16 + $0xf0] sm:$0xff] %v1222_v6  ;;  %v1225_v13 = vadd.f32 -1e-12, %v555_v7  ;;  %v558_v19 = vmul.f32 %v366_v12, %v366_v12  ;;  %v367_v20 = vmax.f32 %v175_v16, 1e-06  ;;  %v178_v25 = vld [vmem:[%s1664_s29 + $0x140] sm:$0xff] }
  0x5d   : > { %937 = vst [vmem:[%s1684_s16 + $0xf8] sm:$0xff] %v1223_v10  ;;  %938 = vst [vmem:[%s1684_s16 + $0x100] sm:$0xff] %v1224_v11  ;;  %v368_v21 = vmax.f32 %v176_v17, 1e-06  ;;  %v369_v22 = vmax.f32 %v177_v18, 1e-06 }
  0x5e   : > { %939 = vst [vmem:[%s1684_s16 + $0x108] sm:$0xff] %v1225_v13  ;;  %v1226_v23 = vadd.f32 -1e-12, %v556_v14  ;;  %v1227_v24 = vadd.f32 -1e-12, %v557_v15  ;;  %v179_v26 = vld [vmem:[%s1664_s29 + $0x148] sm:$0xff]  ;;  %v559_v28 = vmul.f32 %v367_v20, %v367_v20 }
  0x5f   : > { %v1228_v27 = vadd.f32 -1e-12, %v558_v19  ;;  %v560_v29 = vmul.f32 %v368_v21, %v368_v21  ;;  %v561_v30 = vmul.f32 %v369_v22, %v369_v22  ;;  %v180_v31 = vld [vmem:[%s1664_s29 + $0x150] sm:$0xff]  ;;  %v181_v32 = vld [vmem:[%s1664_s29 + $0x158] sm:$0xff]  ;;  %v182_v33 = vld [vmem:[%s1664_s29 + $0x160] sm:$0xff]  ;;  %p2116_p11 = scmp.ne.s32.totalorder %s2113_s17, 0 }
  0x60   : > { %940 = vst [vmem:[%s1684_s16 + $0x110] sm:$0xff] %v1226_v23  ;;  %941 = vst [vmem:[%s1684_s16 + $0x118] sm:$0xff] %v1227_v24  ;;  %v370_v34 = vmax.f32 %v178_v25, 1e-06  ;;  %v371_v35 = vmax.f32 %v179_v26, 1e-06 }
  0x61   : > { %v372_v36 = vmax.f32 %v180_v31, 1e-06  ;;  %942 = vst [vmem:[%s1684_s16 + $0x120] sm:$0xff] %v1228_v27  ;;  %v1229_v37 = vadd.f32 -1e-12, %v559_v28  ;;  %v183_v44 = vld [vmem:[%s1664_s29 + $0x168] sm:$0xff]  ;;  %p1478_p12 = pnand %p1477_p6, %p2116_p11 }
  0x62   : > { %v1230_v38 = vadd.f32 -1e-12, %v560_v29  ;;  %v1231_v39 = vadd.f32 -1e-12, %v561_v30  ;;  %v562_v40 = vmul.f32 %v370_v34, %v370_v34  ;;  %v563_v41 = vmul.f32 %v371_v35, %v371_v35  ;;  %v184_v45 = vld [vmem:[%s1664_s29 + $0x170] sm:$0xff]  ;;  %v185_v46 = vld [vmem:[%s1664_s29 + $0x178] sm:$0xff] }
  0x63   : > { %v564_v42 = vmul.f32 %v372_v36, %v372_v36  ;;  %v373_v43 = vmax.f32 %v181_v32, 1e-06  ;;  %943 = vst [vmem:[%s1684_s16 + $0x128] sm:$0xff] %v1229_v37  ;;  %v374_v47 = vmax.f32 %v182_v33, 1e-06  ;;  %v186_v58 = vld [vmem:[%s1664_s29 + $0x180] sm:$0xff]  ;;  %p1479_p13 = pneg %p1478_p12 }
  0x64   : > { %944 = vst [vmem:[%s1684_s16 + $0x130] sm:$0xff] %v1230_v38  ;;  %945 = vst [vmem:[%s1684_s16 + $0x138] sm:$0xff] %v1231_v39  ;;  %v375_v48 = vmax.f32 %v183_v44, 1e-06  ;;  %v376_v49 = vmax.f32 %v184_v45, 1e-06 }
  0x65   : > { %v1232_v50 = vadd.f32 -1e-12, %v562_v40  ;;  %v1233_v51 = vadd.f32 -1e-12, %v563_v41  ;;  %v1234_v52 = vadd.f32 -1e-12, %v564_v42  ;;  %v565_v53 = vmul.f32 %v373_v43, %v373_v43 }
  0x66   : > { %v566_v54 = vmul.f32 %v374_v47, %v374_v47  ;;  %v567_v55 = vmul.f32 %v375_v48, %v375_v48  ;;  %v568_v56 = vmul.f32 %v376_v49, %v376_v49  ;;  %v377_v57 = vmax.f32 %v185_v46, 1e-06  ;;  %v187_v59 = vld [vmem:[%s1664_s29 + $0x188] sm:$0xff]  ;;  %v188_v60 = vld [vmem:[%s1664_s29 + $0x190] sm:$0xff]  ;;  %v189_v7 = vld [vmem:[%s1664_s29 + $0x198] sm:$0xff]  ;;  %s1547_s3 = smov [#allocation5]  }
  0x67   : > { %946 = vst [vmem:[%s1684_s16 + $0x140] sm:$0xff] %v1232_v50  ;;  %947 = vst [vmem:[%s1684_s16 + $0x148] sm:$0xff] %v1233_v51  ;;  %v1235_v61 = vadd.f32 -1e-12, %v565_v53  ;;  %v378_v62 = vmax.f32 %v186_v58, 1e-06 }
  0x68   : > { %948 = vst [vmem:[%s1684_s16 + $0x150] sm:$0xff] %v1234_v52  ;;  %v379_v63 = vmax.f32 %v187_v59, 1e-06  ;;  %v1236_v0 = vadd.f32 -1e-12, %v566_v54  ;;  %v569_v3 = vmul.f32 %v377_v57, %v377_v57  ;;  %v190_v8 = vld [vmem:[%s1664_s29 + $0x1a0] sm:$0xff] }
  0x69   : > { %v1237_v1 = vadd.f32 -1e-12, %v567_v55  ;;  %v1238_v2 = vadd.f32 -1e-12, %v568_v56  ;;  %949 = vst [vmem:[%s1684_s16 + $0x158] sm:$0xff] %v1235_v61  ;;  %v570_v4 = vmul.f32 %v378_v62, %v378_v62  ;;  %v191_v9 = vld [vmem:[%s1664_s29 + $0x1a8] sm:$0xff] }
  0x6a   : > { %v571_v5 = vmul.f32 %v379_v63, %v379_v63  ;;  %v380_v6 = vmax.f32 %v188_v60, 1e-06  ;;  %950 = vst [vmem:[%s1684_s16 + $0x160] sm:$0xff] %v1236_v0  ;;  %v1239_v10 = vadd.f32 -1e-12, %v569_v3  ;;  %v192_v19 = vld [vmem:[%s1664_s29 + $0x1b0] sm:$0xff] }
  0x6b   : > { %951 = vst [vmem:[%s1684_s16 + $0x168] sm:$0xff] %v1237_v1  ;;  %952 = vst [vmem:[%s1684_s16 + $0x170] sm:$0xff] %v1238_v2  ;;  %v381_v11 = vmax.f32 %v189_v7, 1e-06  ;;  %v382_v12 = vmax.f32 %v190_v8, 1e-06 }
  0x6c   : > { %v1240_v13 = vadd.f32 -1e-12, %v570_v4  ;;  %v1241_v14 = vadd.f32 -1e-12, %v571_v5  ;;  %v572_v15 = vmul.f32 %v380_v6, %v380_v6  ;;  %v383_v16 = vmax.f32 %v191_v9, 1e-06 }
  0x6d   : > { %953 = vst [vmem:[%s1684_s16 + $0x178] sm:$0xff] %v1239_v10  ;;  %v573_v17 = vmul.f32 %v381_v11, %v381_v11  ;;  %v574_v18 = vmul.f32 %v382_v12, %v382_v12  ;;  %v193_v20 = vld [vmem:[%s1664_s29 + $0x1b8] sm:$0xff]  ;;  %v194_v21 = vld [vmem:[%s1664_s29 + $0x1c0] sm:$0xff]  ;;  %v384_v24 = vmax.f32 %v192_v19, 1e-06  ;;  %v195_v32 = vld [vmem:[%s1664_s29 + $0x1c8] sm:$0xff] }
  0x6e   : > { %954 = vst [vmem:[%s1684_s16 + $0x180] sm:$0xff] %v1240_v13  ;;  %955 = vst [vmem:[%s1684_s16 + $0x188] sm:$0xff] %v1241_v14  ;;  %v1242_v22 = vadd.f32 -1e-12, %v572_v15  ;;  %v575_v23 = vmul.f32 %v383_v16, %v383_v16  ;;  %v385_v25 = vmax.f32 %v193_v20, 1e-06 }
  0x6f   : > { %v1243_v26 = vadd.f32 -1e-12, %v573_v17  ;;  %v1244_v27 = vadd.f32 -1e-12, %v574_v18  ;;  %v386_v28 = vmax.f32 %v194_v21, 1e-06  ;;  %v576_v30 = vmul.f32 %v384_v24, %v384_v24 }
  0x70   : > { %956 = vst [vmem:[%s1684_s16 + $0x190] sm:$0xff] %v1242_v22  ;;  %v1245_v29 = vadd.f32 -1e-12, %v575_v23  ;;  %v577_v31 = vmul.f32 %v385_v25, %v385_v25  ;;  %v196_v33 = vld [vmem:[%s1664_s29 + $0x1d0] sm:$0xff]  ;;  %v197_v34 = vld [vmem:[%s1664_s29 + $0x1d8] sm:$0xff]  ;;  %v198_v41 = vld [vmem:[%s1664_s29 + $0x1e0] sm:$0xff] }
  0x71   : > { %957 = vst [vmem:[%s1684_s16 + $0x198] sm:$0xff] %v1243_v26  ;;  %958 = vst [vmem:[%s1684_s16 + $0x1a0] sm:$0xff] %v1244_v27  ;;  %v578_v35 = vmul.f32 %v386_v28, %v386_v28  ;;  %v387_v36 = vmax.f32 %v195_v32, 1e-06  ;;  %v388_v37 = vmax.f32 %v196_v33, 1e-06 }
  0x72   : > { %v389_v38 = vmax.f32 %v197_v34, 1e-06  ;;  %959 = vst [vmem:[%s1684_s16 + $0x1a8] sm:$0xff] %v1245_v29  ;;  %v1246_v39 = vadd.f32 -1e-12, %v576_v30  ;;  %v199_v42 = vld [vmem:[%s1664_s29 + $0x1e8] sm:$0xff] }
  0x73   : > { %v1247_v40 = vadd.f32 -1e-12, %v577_v31  ;;  %v1248_v43 = vadd.f32 -1e-12, %v578_v35  ;;  %v579_v44 = vmul.f32 %v387_v36, %v387_v36  ;;  %v580_v45 = vmul.f32 %v388_v37, %v388_v37  ;;  %v200_v47 = vld [vmem:[%s1664_s29 + $0x1f0] sm:$0xff]  ;;  %v201_v48 = vld [vmem:[%s1664_s29 + $0x1f8] sm:$0xff] }
  0x74   : > { %v581_v46 = vmul.f32 %v389_v38, %v389_v38  ;;  %v202_v49 = vld [vmem:[%s1664_s29 + $0x200] sm:$0xff]  ;;  %960 = vst [vmem:[%s1684_s16 + $0x1b0] sm:$0xff] %v1246_v39  ;;  %v390_v50 = vmax.f32 %v198_v41, 1e-06  ;;  %v391_v51 = vmax.f32 %v199_v42, 1e-06 }
  0x75   : > { %961 = vst [vmem:[%s1684_s16 + $0x1b8] sm:$0xff] %v1247_v40  ;;  %v392_v52 = vmax.f32 %v200_v47, 1e-06  ;;  %962 = vst [vmem:[%s1684_s16 + $0x1c0] sm:$0xff] %v1248_v43  ;;  %v1249_v53 = vadd.f32 -1e-12, %v579_v44 }
  0x76   : > { %v1250_v54 = vadd.f32 -1e-12, %v580_v45  ;;  %v1251_v55 = vadd.f32 -1e-12, %v581_v46  ;;  %v582_v56 = vmul.f32 %v390_v50, %v390_v50  ;;  %v583_v57 = vmul.f32 %v391_v51, %v391_v51  ;;  %v203_v60 = vld [vmem:[%s1664_s29 + $0x208] sm:$0xff]  ;;  %v204_v61 = vld [vmem:[%s1664_s29 + $0x210] sm:$0xff] }
  0x77   : > { %v584_v58 = vmul.f32 %v392_v52, %v392_v52  ;;  %v393_v59 = vmax.f32 %v201_v48, 1e-06  ;;  %v205_v62 = vld [vmem:[%s1664_s29 + $0x218] sm:$0xff]  ;;  %963 = vst [vmem:[%s1684_s16 + $0x1c8] sm:$0xff] %v1249_v53  ;;  %v394_v63 = vmax.f32 %v202_v49, 1e-06 }
  0x78   : > { %964 = vst [vmem:[%s1684_s16 + $0x1d0] sm:$0xff] %v1250_v54  ;;  %965 = vst [vmem:[%s1684_s16 + $0x1d8] sm:$0xff] %v1251_v55  ;;  %v395_v0 = vmax.f32 %v203_v60, 1e-06  ;;  %v396_v1 = vmax.f32 %v204_v61, 1e-06 }
  0x79   : > { %v1252_v2 = vadd.f32 -1e-12, %v582_v56  ;;  %v1253_v3 = vadd.f32 -1e-12, %v583_v57  ;;  %v1254_v4 = vadd.f32 -1e-12, %v584_v58  ;;  %v585_v5 = vmul.f32 %v393_v59, %v393_v59 }
  0x7a   : > { %v586_v6 = vmul.f32 %v394_v63, %v394_v63  ;;  %v587_v7 = vmul.f32 %v395_v0, %v395_v0  ;;  %v588_v8 = vmul.f32 %v396_v1, %v396_v1  ;;  %v397_v9 = vmax.f32 %v205_v62, 1e-06  ;;  %v206_v10 = vld [vmem:[%s1664_s29 + $0x220] sm:$0xff]  ;;  %v207_v11 = vld [vmem:[%s1664_s29 + $0x228] sm:$0xff]  ;;  %v208_v12 = vld [vmem:[%s1664_s29 + $0x230] sm:$0xff]  ;;  %s1480_s4 = sshll.u32 %s1547_s3, 4  ;;  %s1481_s4 = int_to_ptr.vmem [resolvable:$false] %s1480_s4 }
  0x7b   : > { %966 = vst [vmem:[%s1684_s16 + $0x1e0] sm:$0xff] %v1252_v2  ;;  %967 = vst [vmem:[%s1684_s16 + $0x1e8] sm:$0xff] %v1253_v3  ;;  %v1255_v13 = vadd.f32 -1e-12, %v585_v5  ;;  %v398_v14 = vmax.f32 %v206_v10, 1e-06  ;;  %p1483_p8 = scmp.lt.s32.totalorder %s2063_s10, %s1481_s4 }
  0x7c   : > { %968 = vst [vmem:[%s1684_s16 + $0x1f0] sm:$0xff] %v1254_v4  ;;  %v399_v15 = vmax.f32 %v207_v11, 1e-06  ;;  %v1256_v16 = vadd.f32 -1e-12, %v586_v6  ;;  %v589_v19 = vmul.f32 %v397_v9, %v397_v9  ;;  %v209_v23 = vld [vmem:[%s1664_s29 + $0x238] sm:$0xff] }
  0x7d   : > { %v1257_v17 = vadd.f32 -1e-12, %v587_v7  ;;  %v1258_v18 = vadd.f32 -1e-12, %v588_v8  ;;  %969 = vst [vmem:[%s1684_s16 + $0x1f8] sm:$0xff] %v1255_v13  ;;  %v590_v20 = vmul.f32 %v398_v14, %v398_v14  ;;  %v210_v24 = vld [vmem:[%s1664_s29 + $0x240] sm:$0xff] }
  0x7e   : > { %v591_v21 = vmul.f32 %v399_v15, %v399_v15  ;;  %v400_v22 = vmax.f32 %v208_v12, 1e-06  ;;  %v211_v25 = vld [vmem:[%s1664_s29 + $0x248] sm:$0xff]  ;;  %970 = vst [vmem:[%s1684_s16 + $0x200] sm:$0xff] %v1256_v16  ;;  %v1259_v26 = vadd.f32 -1e-12, %v589_v19 }
  0x7f   : > { %971 = vst [vmem:[%s1684_s16 + $0x208] sm:$0xff] %v1257_v17  ;;  %972 = vst [vmem:[%s1684_s16 + $0x210] sm:$0xff] %v1258_v18  ;;  %v401_v27 = vmax.f32 %v209_v23, 1e-06  ;;  %v402_v28 = vmax.f32 %v210_v24, 1e-06 }
  0x80   : > { %v1260_v29 = vadd.f32 -1e-12, %v590_v20  ;;  %v1261_v30 = vadd.f32 -1e-12, %v591_v21  ;;  %v592_v31 = vmul.f32 %v400_v22, %v400_v22  ;;  %v403_v32 = vmax.f32 %v211_v25, 1e-06 }
  0x81   : > { %973 = vst [vmem:[%s1684_s16 + $0x218] sm:$0xff] %v1259_v26  ;;  %v593_v33 = vmul.f32 %v401_v27, %v401_v27  ;;  %v594_v34 = vmul.f32 %v402_v28, %v402_v28  ;;  %v212_v35 = vld [vmem:[%s1664_s29 + $0x250] sm:$0xff]  ;;  %v213_v36 = vld [vmem:[%s1664_s29 + $0x258] sm:$0xff]  ;;  %v214_v37 = vld [vmem:[%s1664_s29 + $0x260] sm:$0xff]  ;;  %s1482_s5 = scalar_lea.vmem %s1481_s4, 49152 }
  0x82   : > { %974 = vst [vmem:[%s1684_s16 + $0x220] sm:$0xff] %v1260_v29  ;;  %975 = vst [vmem:[%s1684_s16 + $0x228] sm:$0xff] %v1261_v30  ;;  %v1262_v38 = vadd.f32 -1e-12, %v592_v31  ;;  %v595_v39 = vmul.f32 %v403_v32, %v403_v32  ;;  %v404_v40 = vmax.f32 %v212_v35, 1e-06  ;;  %p1484_p10 = scmp.lt.s32.totalorder %s1482_s5, %s1476_s2 }
  0x83   : > { %v405_v41 = vmax.f32 %v213_v36, 1e-06  ;;  %v1263_v42 = vadd.f32 -1e-12, %v593_v33  ;;  %v1264_v43 = vadd.f32 -1e-12, %v594_v34 }
  0x84   : > { %v406_v44 = vmax.f32 %v214_v37, 1e-06  ;;  %976 = vst [vmem:[%s1684_s16 + $0x230] sm:$0xff] %v1262_v38  ;;  %v1265_v45 = vadd.f32 -1e-12, %v595_v39  ;;  %v596_v46 = vmul.f32 %v404_v40, %v404_v40  ;;  %v215_v48 = vld [vmem:[%s1664_s29 + $0x268] sm:$0xff]  ;;  %p1485_p0 = por %p1484_p10, %p1483_p8 }
  0x85   : > { %v597_v47 = vmul.f32 %v405_v41, %v405_v41  ;;  %v216_v49 = vld [vmem:[%s1664_s29 + $0x270] sm:$0xff]  ;;  %v217_v50 = vld [vmem:[%s1664_s29 + $0x278] sm:$0xff]  ;;  %977 = vst [vmem:[%s1684_s16 + $0x238] sm:$0xff] %v1263_v42  ;;  %978 = vst [vmem:[%s1684_s16 + $0x240] sm:$0xff] %v1264_v43  ;;  %v407_v52 = vmax.f32 %v215_v48, 1e-06 }
  0x86   : > { %v598_v51 = vmul.f32 %v406_v44, %v406_v44  ;;  %v408_v53 = vmax.f32 %v216_v49, 1e-06  ;;  %v409_v54 = vmax.f32 %v217_v50, 1e-06  ;;  %979 = vst [vmem:[%s1684_s16 + $0x248] sm:$0xff] %v1265_v45  ;;  %v218_v57 = vld [vmem:[%s1664_s29 + $0x280] sm:$0xff]  ;;  %p1486_p2 = pnand %p1485_p0, %p1479_p13 }
  0x87   : > { %v1266_v55 = vadd.f32 -1e-12, %v596_v46  ;;  %v1267_v56 = vadd.f32 -1e-12, %v597_v47  ;;  %v219_v58 = vld [vmem:[%s1664_s29 + $0x288] sm:$0xff]  ;;  %v599_v60 = vmul.f32 %v407_v52, %v407_v52  ;;  %v220_v63 = vld [vmem:[%s1664_s29 + $0x290] sm:$0xff] }
  0x88   : > { %v1268_v59 = vadd.f32 -1e-12, %v598_v51  ;;  %v600_v61 = vmul.f32 %v408_v53, %v408_v53  ;;  %v601_v62 = vmul.f32 %v409_v54, %v409_v54  ;;  %v221_v0 = vld [vmem:[%s1664_s29 + $0x298] sm:$0xff]  ;;  %v222_v1 = vld [vmem:[%s1664_s29 + $0x2a0] sm:$0xff]  ;;  %v410_v2 = vmax.f32 %v218_v57, 1e-06 }
  0x89   : > { %980 = vst [vmem:[%s1684_s16 + $0x250] sm:$0xff] %v1266_v55  ;;  %981 = vst [vmem:[%s1684_s16 + $0x258] sm:$0xff] %v1267_v56  ;;  %v411_v3 = vmax.f32 %v219_v58, 1e-06  ;;  %v412_v4 = vmax.f32 %v220_v63, 1e-06 }
  0x8a   : > { %982 = vst [vmem:[%s1684_s16 + $0x260] sm:$0xff] %v1268_v59  ;;  %v1269_v5 = vadd.f32 -1e-12, %v599_v60  ;;  %v1270_v6 = vadd.f32 -1e-12, %v600_v61  ;;  %v602_v8 = vmul.f32 %v410_v2, %v410_v2  ;;  %v223_v12 = vld [vmem:[%s1664_s29 + $0x2a8] sm:$0xff] }
  0x8b   : > { %v1271_v7 = vadd.f32 -1e-12, %v601_v62  ;;  %v603_v9 = vmul.f32 %v411_v3, %v411_v3  ;;  %v604_v10 = vmul.f32 %v412_v4, %v412_v4  ;;  %v413_v11 = vmax.f32 %v221_v0, 1e-06  ;;  %v224_v13 = vld [vmem:[%s1664_s29 + $0x2b0] sm:$0xff]  ;;  %v225_v14 = vld [vmem:[%s1664_s29 + $0x2b8] sm:$0xff] }
  0x8c   : > { %983 = vst [vmem:[%s1684_s16 + $0x268] sm:$0xff] %v1269_v5  ;;  %984 = vst [vmem:[%s1684_s16 + $0x270] sm:$0xff] %v1270_v6  ;;  %v414_v15 = vmax.f32 %v222_v1, 1e-06  ;;  %v415_v16 = vmax.f32 %v223_v12, 1e-06 }
  0x8d   : > { %985 = vst [vmem:[%s1684_s16 + $0x278] sm:$0xff] %v1271_v7  ;;  %v416_v17 = vmax.f32 %v224_v13, 1e-06  ;;  %v1272_v18 = vadd.f32 -1e-12, %v602_v8  ;;  %v605_v21 = vmul.f32 %v413_v11, %v413_v11  ;;  %v226_v26 = vld [vmem:[%s1664_s29 + $0x2c0] sm:$0xff] }
  0x8e   : > { %v1273_v19 = vadd.f32 -1e-12, %v603_v9  ;;  %v1274_v20 = vadd.f32 -1e-12, %v604_v10  ;;  %v606_v22 = vmul.f32 %v414_v15, %v414_v15  ;;  %v607_v23 = vmul.f32 %v415_v16, %v415_v16  ;;  %v227_v27 = vld [vmem:[%s1664_s29 + $0x2c8] sm:$0xff]  ;;  %v228_v28 = vld [vmem:[%s1664_s29 + $0x2d0] sm:$0xff] }
  0x8f   : > { %v608_v24 = vmul.f32 %v416_v17, %v416_v17  ;;  %v417_v25 = vmax.f32 %v225_v14, 1e-06  ;;  %986 = vst [vmem:[%s1684_s16 + $0x280] sm:$0xff] %v1272_v18  ;;  %v1275_v29 = vadd.f32 -1e-12, %v605_v21  ;;  %v229_v39 = vld [vmem:[%s1664_s29 + $0x2d8] sm:$0xff] }
  0x90   : > { %987 = vst [vmem:[%s1684_s16 + $0x288] sm:$0xff] %v1273_v19  ;;  %988 = vst [vmem:[%s1684_s16 + $0x290] sm:$0xff] %v1274_v20  ;;  %v418_v30 = vmax.f32 %v226_v26, 1e-06  ;;  %v419_v31 = vmax.f32 %v227_v27, 1e-06 }
  0x91   : > { %v1276_v32 = vadd.f32 -1e-12, %v606_v22  ;;  %v1277_v33 = vadd.f32 -1e-12, %v607_v23  ;;  %v1278_v34 = vadd.f32 -1e-12, %v608_v24  ;;  %v609_v35 = vmul.f32 %v417_v25, %v417_v25 }
  0x92   : > { %989 = vst [vmem:[%s1684_s16 + $0x298] sm:$0xff] %v1275_v29  ;;  %v610_v36 = vmul.f32 %v418_v30, %v418_v30  ;;  %v611_v37 = vmul.f32 %v419_v31, %v419_v31  ;;  %v420_v38 = vmax.f32 %v228_v28, 1e-06  ;;  %v230_v40 = vld [vmem:[%s1664_s29 + $0x2e0] sm:$0xff]  ;;  %v231_v41 = vld [vmem:[%s1664_s29 + $0x2e8] sm:$0xff]  ;;  %v232_v51 = vld [vmem:[%s1664_s29 + $0x2f0] sm:$0xff] }
  0x93   : > { %990 = vst [vmem:[%s1684_s16 + $0x2a0] sm:$0xff] %v1276_v32  ;;  %991 = vst [vmem:[%s1684_s16 + $0x2a8] sm:$0xff] %v1277_v33  ;;  %v1279_v42 = vadd.f32 -1e-12, %v609_v35  ;;  %v421_v43 = vmax.f32 %v229_v39, 1e-06 }
  0x94   : > { %992 = vst [vmem:[%s1684_s16 + $0x2b0] sm:$0xff] %v1278_v34  ;;  %v422_v44 = vmax.f32 %v230_v40, 1e-06  ;;  %v1280_v45 = vadd.f32 -1e-12, %v610_v36  ;;  %v612_v47 = vmul.f32 %v420_v38, %v420_v38  ;;  %v233_v52 = vld [vmem:[%s1664_s29 + $0x2f8] sm:$0xff] }
  0x95   : > { %v1281_v46 = vadd.f32 -1e-12, %v611_v37  ;;  %v423_v48 = vmax.f32 %v231_v41, 1e-06  ;;  %993 = vst [vmem:[%s1684_s16 + $0x2b8] sm:$0xff] %v1279_v42  ;;  %v613_v49 = vmul.f32 %v421_v43, %v421_v43  ;;  %v234_v53 = vld [vmem:[%s1664_s29 + $0x300] sm:$0xff] }
  0x96   : > { %v614_v50 = vmul.f32 %v422_v44, %v422_v44  ;;  %994 = vst [vmem:[%s1684_s16 + $0x2c0] sm:$0xff] %v1280_v45  ;;  %v1282_v54 = vadd.f32 -1e-12, %v612_v47  ;;  %v424_v56 = vmax.f32 %v232_v51, 1e-06  ;;  %v235_v0 = vld [vmem:[%s1664_s29 + $0x308] sm:$0xff] }
  0x97   : > { %995 = vst [vmem:[%s1684_s16 + $0x2c8] sm:$0xff] %v1281_v46  ;;  %v615_v55 = vmul.f32 %v423_v48, %v423_v48  ;;  %v425_v57 = vmax.f32 %v233_v52, 1e-06  ;;  %v1283_v58 = vadd.f32 -1e-12, %v613_v49  ;;  %v236_v1 = vld [vmem:[%s1664_s29 + $0x310] sm:$0xff] }
  0x98   : > { %v1284_v59 = vadd.f32 -1e-12, %v614_v50  ;;  %v426_v60 = vmax.f32 %v234_v53, 1e-06  ;;  %996 = vst [vmem:[%s1684_s16 + $0x2d0] sm:$0xff] %v1282_v54  ;;  %v616_v62 = vmul.f32 %v424_v56, %v424_v56  ;;  %v237_v2 = vld [vmem:[%s1664_s29 + $0x318] sm:$0xff] }
  0x99   : > { %v1285_v61 = vadd.f32 -1e-12, %v615_v55  ;;  %v617_v63 = vmul.f32 %v425_v57, %v425_v57  ;;  %997 = vst [vmem:[%s1684_s16 + $0x2d8] sm:$0xff] %v1283_v58  ;;  %v427_v4 = vmax.f32 %v235_v0, 1e-06  ;;  %v238_v9 = vld [vmem:[%s1664_s29 + $0x320] sm:$0xff] }
  0x9a   : > { %998 = vst [vmem:[%s1684_s16 + $0x2e0] sm:$0xff] %v1284_v59  ;;  %v618_v3 = vmul.f32 %v426_v60, %v426_v60  ;;  %v428_v5 = vmax.f32 %v236_v1, 1e-06  ;;  %v429_v6 = vmax.f32 %v237_v2, 1e-06  ;;  %v239_v10 = vld [vmem:[%s1664_s29 + $0x328] sm:$0xff] }
  0x9b   : > { %999 = vst [vmem:[%s1684_s16 + $0x2e8] sm:$0xff] %v1285_v61  ;;  %v1286_v7 = vadd.f32 -1e-12, %v616_v62  ;;  %v1287_v8 = vadd.f32 -1e-12, %v617_v63  ;;  %v619_v12 = vmul.f32 %v427_v4, %v427_v4  ;;  %v240_v15 = vld [vmem:[%s1664_s29 + $0x330] sm:$0xff] }
  0x9c   : > { %v1288_v11 = vadd.f32 -1e-12, %v618_v3  ;;  %v620_v13 = vmul.f32 %v428_v5, %v428_v5  ;;  %v621_v14 = vmul.f32 %v429_v6, %v429_v6  ;;  %v241_v16 = vld [vmem:[%s1664_s29 + $0x338] sm:$0xff]  ;;  %v242_v17 = vld [vmem:[%s1664_s29 + $0x340] sm:$0xff]  ;;  %v430_v18 = vmax.f32 %v238_v9, 1e-06 }
  0x9d   : > { %1000 = vst [vmem:[%s1684_s16 + $0x2f0] sm:$0xff] %v1286_v7  ;;  %1001 = vst [vmem:[%s1684_s16 + $0x2f8] sm:$0xff] %v1287_v8  ;;  %v431_v19 = vmax.f32 %v239_v10, 1e-06  ;;  %v432_v20 = vmax.f32 %v240_v15, 1e-06 }
  0x9e   : > { %1002 = vst [vmem:[%s1684_s16 + $0x300] sm:$0xff] %v1288_v11  ;;  %v1289_v21 = vadd.f32 -1e-12, %v619_v12  ;;  %v1290_v22 = vadd.f32 -1e-12, %v620_v13  ;;  %v622_v24 = vmul.f32 %v430_v18, %v430_v18  ;;  %v243_v28 = vld [vmem:[%s1664_s29 + $0x348] sm:$0xff] }
  0x9f   : > { %v1291_v23 = vadd.f32 -1e-12, %v621_v14  ;;  %v623_v25 = vmul.f32 %v431_v19, %v431_v19  ;;  %v624_v26 = vmul.f32 %v432_v20, %v432_v20  ;;  %v433_v27 = vmax.f32 %v241_v16, 1e-06  ;;  %v244_v29 = vld [vmem:[%s1664_s29 + $0x350] sm:$0xff]  ;;  %v245_v30 = vld [vmem:[%s1664_s29 + $0x358] sm:$0xff] }
  0xa0   : > { %1003 = vst [vmem:[%s1684_s16 + $0x308] sm:$0xff] %v1289_v21  ;;  %1004 = vst [vmem:[%s1684_s16 + $0x310] sm:$0xff] %v1290_v22  ;;  %v434_v31 = vmax.f32 %v242_v17, 1e-06  ;;  %v435_v32 = vmax.f32 %v243_v28, 1e-06 }
  0xa1   : > { %1005 = vst [vmem:[%s1684_s16 + $0x318] sm:$0xff] %v1291_v23  ;;  %v436_v33 = vmax.f32 %v244_v29, 1e-06  ;;  %v1292_v34 = vadd.f32 -1e-12, %v622_v24  ;;  %v625_v37 = vmul.f32 %v433_v27, %v433_v27  ;;  %v246_v42 = vld [vmem:[%s1664_s29 + $0x360] sm:$0xff] }
  0xa2   : > { %v1293_v35 = vadd.f32 -1e-12, %v623_v25  ;;  %v1294_v36 = vadd.f32 -1e-12, %v624_v26  ;;  %v626_v38 = vmul.f32 %v434_v31, %v434_v31  ;;  %v627_v39 = vmul.f32 %v435_v32, %v435_v32  ;;  %v247_v43 = vld [vmem:[%s1664_s29 + $0x368] sm:$0xff]  ;;  %v248_v44 = vld [vmem:[%s1664_s29 + $0x370] sm:$0xff] }
  0xa3   : > { %v628_v40 = vmul.f32 %v436_v33, %v436_v33  ;;  %v437_v41 = vmax.f32 %v245_v30, 1e-06  ;;  %1006 = vst [vmem:[%s1684_s16 + $0x320] sm:$0xff] %v1292_v34  ;;  %v1295_v45 = vadd.f32 -1e-12, %v625_v37  ;;  %v249_v55 = vld [vmem:[%s1664_s29 + $0x378] sm:$0xff] }
  0xa4   : > { %1007 = vst [vmem:[%s1684_s16 + $0x328] sm:$0xff] %v1293_v35  ;;  %1008 = vst [vmem:[%s1684_s16 + $0x330] sm:$0xff] %v1294_v36  ;;  %v438_v46 = vmax.f32 %v246_v42, 1e-06  ;;  %v439_v47 = vmax.f32 %v247_v43, 1e-06 }
  0xa5   : > { %v1296_v48 = vadd.f32 -1e-12, %v626_v38  ;;  %v1297_v49 = vadd.f32 -1e-12, %v627_v39  ;;  %v1298_v50 = vadd.f32 -1e-12, %v628_v40  ;;  %v629_v51 = vmul.f32 %v437_v41, %v437_v41 }
  0xa6   : > { %1009 = vst [vmem:[%s1684_s16 + $0x338] sm:$0xff] %v1295_v45  ;;  %v630_v52 = vmul.f32 %v438_v46, %v438_v46  ;;  %v631_v53 = vmul.f32 %v439_v47, %v439_v47  ;;  %v440_v54 = vmax.f32 %v248_v44, 1e-06  ;;  %v250_v56 = vld [vmem:[%s1664_s29 + $0x380] sm:$0xff]  ;;  %v251_v57 = vld [vmem:[%s1664_s29 + $0x388] sm:$0xff]  ;;  %v252_v3 = vld [vmem:[%s1664_s29 + $0x390] sm:$0xff] }
  0xa7   : > { %1010 = vst [vmem:[%s1684_s16 + $0x340] sm:$0xff] %v1296_v48  ;;  %1011 = vst [vmem:[%s1684_s16 + $0x348] sm:$0xff] %v1297_v49  ;;  %v1299_v58 = vadd.f32 -1e-12, %v629_v51  ;;  %v441_v59 = vmax.f32 %v249_v55, 1e-06 }
  0xa8   : > { %1012 = vst [vmem:[%s1684_s16 + $0x350] sm:$0xff] %v1298_v50  ;;  %v442_v60 = vmax.f32 %v250_v56, 1e-06  ;;  %v1300_v61 = vadd.f32 -1e-12, %v630_v52  ;;  %v632_v63 = vmul.f32 %v440_v54, %v440_v54  ;;  %v253_v4 = vld [vmem:[%s1664_s29 + $0x398] sm:$0xff] }
  0xa9   : > { %v1301_v62 = vadd.f32 -1e-12, %v631_v53  ;;  %v443_v0 = vmax.f32 %v251_v57, 1e-06  ;;  %1013 = vst [vmem:[%s1684_s16 + $0x358] sm:$0xff] %v1299_v58  ;;  %v633_v1 = vmul.f32 %v441_v59, %v441_v59  ;;  %v254_v5 = vld [vmem:[%s1664_s29 + $0x3a0] sm:$0xff] }
  0xaa   : > { %v634_v2 = vmul.f32 %v442_v60, %v442_v60  ;;  %1014 = vst [vmem:[%s1684_s16 + $0x360] sm:$0xff] %v1300_v61  ;;  %v1302_v6 = vadd.f32 -1e-12, %v632_v63  ;;  %v444_v8 = vmax.f32 %v252_v3, 1e-06  ;;  %v255_v16 = vld [vmem:[%s1664_s29 + $0x3a8] sm:$0xff] }
  0xab   : > { %1015 = vst [vmem:[%s1684_s16 + $0x368] sm:$0xff] %v1301_v62  ;;  %v635_v7 = vmul.f32 %v443_v0, %v443_v0  ;;  %v445_v9 = vmax.f32 %v253_v4, 1e-06  ;;  %v1303_v10 = vadd.f32 -1e-12, %v633_v1  ;;  %v256_v17 = vld [vmem:[%s1664_s29 + $0x3b0] sm:$0xff] }
  0xac   : > { %v1304_v11 = vadd.f32 -1e-12, %v634_v2  ;;  %v446_v12 = vmax.f32 %v254_v5, 1e-06  ;;  %1016 = vst [vmem:[%s1684_s16 + $0x370] sm:$0xff] %v1302_v6  ;;  %v636_v14 = vmul.f32 %v444_v8, %v444_v8  ;;  %v257_v18 = vld [vmem:[%s1664_s29 + $0x3b8] sm:$0xff] }
  0xad   : > { %v1305_v13 = vadd.f32 -1e-12, %v635_v7  ;;  %v637_v15 = vmul.f32 %v445_v9, %v445_v9  ;;  %1017 = vst [vmem:[%s1684_s16 + $0x378] sm:$0xff] %v1303_v10  ;;  %v447_v20 = vmax.f32 %v255_v16, 1e-06  ;;  %v258_v25 = vld [vmem:[%s1664_s29 + $0x3c0] sm:$0xff] }
  0xae   : > { %1018 = vst [vmem:[%s1684_s16 + $0x380] sm:$0xff] %v1304_v11  ;;  %v638_v19 = vmul.f32 %v446_v12, %v446_v12  ;;  %v448_v21 = vmax.f32 %v256_v17, 1e-06  ;;  %v449_v22 = vmax.f32 %v257_v18, 1e-06  ;;  %v259_v26 = vld [vmem:[%s1664_s29 + $0x3c8] sm:$0xff] }
  0xaf   : > { %1019 = vst [vmem:[%s1684_s16 + $0x388] sm:$0xff] %v1305_v13  ;;  %v1306_v23 = vadd.f32 -1e-12, %v636_v14  ;;  %v1307_v24 = vadd.f32 -1e-12, %v637_v15  ;;  %v639_v28 = vmul.f32 %v447_v20, %v447_v20  ;;  %v260_v31 = vld [vmem:[%s1664_s29 + $0x3d0] sm:$0xff] }
  0xb0   : > { %v1308_v27 = vadd.f32 -1e-12, %v638_v19  ;;  %v640_v29 = vmul.f32 %v448_v21, %v448_v21  ;;  %v641_v30 = vmul.f32 %v449_v22, %v449_v22  ;;  %v261_v32 = vld [vmem:[%s1664_s29 + $0x3d8] sm:$0xff]  ;;  %v262_v33 = vld [vmem:[%s1664_s29 + $0x3e0] sm:$0xff]  ;;  %v450_v34 = vmax.f32 %v258_v25, 1e-06 }
  0xb1   : > { %1020 = vst [vmem:[%s1684_s16 + $0x390] sm:$0xff] %v1306_v23  ;;  %1021 = vst [vmem:[%s1684_s16 + $0x398] sm:$0xff] %v1307_v24  ;;  %v451_v35 = vmax.f32 %v259_v26, 1e-06  ;;  %v452_v36 = vmax.f32 %v260_v31, 1e-06 }
  0xb2   : > { %1022 = vst [vmem:[%s1684_s16 + $0x3a0] sm:$0xff] %v1308_v27  ;;  %v1309_v37 = vadd.f32 -1e-12, %v639_v28  ;;  %v1310_v38 = vadd.f32 -1e-12, %v640_v29  ;;  %v642_v40 = vmul.f32 %v450_v34, %v450_v34  ;;  %v263_v44 = vld [vmem:[%s1664_s29 + $0x3e8] sm:$0xff] }
  0xb3   : > { %v1311_v39 = vadd.f32 -1e-12, %v641_v30  ;;  %v643_v41 = vmul.f32 %v451_v35, %v451_v35  ;;  %v644_v42 = vmul.f32 %v452_v36, %v452_v36  ;;  %v453_v43 = vmax.f32 %v261_v32, 1e-06  ;;  %v264_v45 = vld [vmem:[%s1664_s29 + $0x3f0] sm:$0xff]  ;;  %v265_v46 = vld [vmem:[%s1664_s29 + $0x3f8] sm:$0xff] }
  0xb4   : > { %1023 = vst [vmem:[%s1684_s16 + $0x3a8] sm:$0xff] %v1309_v37  ;;  %1024 = vst [vmem:[%s1684_s16 + $0x3b0] sm:$0xff] %v1310_v38  ;;  %v454_v47 = vmax.f32 %v262_v33, 1e-06  ;;  %v455_v48 = vmax.f32 %v263_v44, 1e-06 }
  0xb5   : > { %1025 = vst [vmem:[%s1684_s16 + $0x3b8] sm:$0xff] %v1311_v39  ;;  %v456_v49 = vmax.f32 %v264_v45, 1e-06  ;;  %v1312_v50 = vadd.f32 -1e-12, %v642_v40  ;;  %v645_v53 = vmul.f32 %v453_v43, %v453_v43  ;;  %v266_v58 = vld [vmem:[%s1664_s29 + $0x400] sm:$0xff] }
  0xb6   : > { %v1313_v51 = vadd.f32 -1e-12, %v643_v41  ;;  %v1314_v52 = vadd.f32 -1e-12, %v644_v42  ;;  %v646_v54 = vmul.f32 %v454_v47, %v454_v47  ;;  %v647_v55 = vmul.f32 %v455_v48, %v455_v48  ;;  %v267_v59 = vld [vmem:[%s1664_s29 + $0x408] sm:$0xff]  ;;  %v268_v60 = vld [vmem:[%s1664_s29 + $0x410] sm:$0xff] }
  0xb7   : > { %v648_v56 = vmul.f32 %v456_v49, %v456_v49  ;;  %v457_v57 = vmax.f32 %v265_v46, 1e-06  ;;  %1026 = vst [vmem:[%s1684_s16 + $0x3c0] sm:$0xff] %v1312_v50  ;;  %v1315_v61 = vadd.f32 -1e-12, %v645_v53  ;;  %v269_v7 = vld [vmem:[%s1664_s29 + $0x418] sm:$0xff] }
  0xb8   : > { %1027 = vst [vmem:[%s1684_s16 + $0x3c8] sm:$0xff] %v1313_v51  ;;  %1028 = vst [vmem:[%s1684_s16 + $0x3d0] sm:$0xff] %v1314_v52  ;;  %v458_v62 = vmax.f32 %v266_v58, 1e-06  ;;  %v459_v63 = vmax.f32 %v267_v59, 1e-06 }
  0xb9   : > { %v1316_v0 = vadd.f32 -1e-12, %v646_v54  ;;  %v1317_v1 = vadd.f32 -1e-12, %v647_v55  ;;  %v1318_v2 = vadd.f32 -1e-12, %v648_v56  ;;  %v649_v3 = vmul.f32 %v457_v57, %v457_v57 }
  0xba   : > { %1029 = vst [vmem:[%s1684_s16 + $0x3d8] sm:$0xff] %v1315_v61  ;;  %v650_v4 = vmul.f32 %v458_v62, %v458_v62  ;;  %v651_v5 = vmul.f32 %v459_v63, %v459_v63  ;;  %v460_v6 = vmax.f32 %v268_v60, 1e-06  ;;  %v270_v8 = vld [vmem:[%s1664_s29 + $0x420] sm:$0xff]  ;;  %v271_v9 = vld [vmem:[%s1664_s29 + $0x428] sm:$0xff]  ;;  %v272_v19 = vld [vmem:[%s1664_s29 + $0x430] sm:$0xff] }
  0xbb   : > { %1030 = vst [vmem:[%s1684_s16 + $0x3e0] sm:$0xff] %v1316_v0  ;;  %1031 = vst [vmem:[%s1684_s16 + $0x3e8] sm:$0xff] %v1317_v1  ;;  %v1319_v10 = vadd.f32 -1e-12, %v649_v3  ;;  %v461_v11 = vmax.f32 %v269_v7, 1e-06 }
  0xbc   : > { %1032 = vst [vmem:[%s1684_s16 + $0x3f0] sm:$0xff] %v1318_v2  ;;  %v462_v12 = vmax.f32 %v270_v8, 1e-06  ;;  %v1320_v13 = vadd.f32 -1e-12, %v650_v4  ;;  %v652_v15 = vmul.f32 %v460_v6, %v460_v6  ;;  %v273_v20 = vld [vmem:[%s1664_s29 + $0x438] sm:$0xff] }
  0xbd   : > { %v1321_v14 = vadd.f32 -1e-12, %v651_v5  ;;  %v463_v16 = vmax.f32 %v271_v9, 1e-06  ;;  %1033 = vst [vmem:[%s1684_s16 + $0x3f8] sm:$0xff] %v1319_v10  ;;  %v653_v17 = vmul.f32 %v461_v11, %v461_v11  ;;  %v274_v21 = vld [vmem:[%s1664_s29 + $0x440] sm:$0xff] }
  0xbe   : > { %v654_v18 = vmul.f32 %v462_v12, %v462_v12  ;;  %1034 = vst [vmem:[%s1684_s16 + $0x400] sm:$0xff] %v1320_v13  ;;  %v1322_v22 = vadd.f32 -1e-12, %v652_v15  ;;  %v464_v24 = vmax.f32 %v272_v19, 1e-06  ;;  %v275_v32 = vld [vmem:[%s1664_s29 + $0x448] sm:$0xff] }
  0xbf   : > { %1035 = vst [vmem:[%s1684_s16 + $0x408] sm:$0xff] %v1321_v14  ;;  %v655_v23 = vmul.f32 %v463_v16, %v463_v16  ;;  %v465_v25 = vmax.f32 %v273_v20, 1e-06  ;;  %v1323_v26 = vadd.f32 -1e-12, %v653_v17  ;;  %v276_v33 = vld [vmem:[%s1664_s29 + $0x450] sm:$0xff] }
  0xc0   : > { %v1324_v27 = vadd.f32 -1e-12, %v654_v18  ;;  %v466_v28 = vmax.f32 %v274_v21, 1e-06  ;;  %1036 = vst [vmem:[%s1684_s16 + $0x410] sm:$0xff] %v1322_v22  ;;  %v656_v30 = vmul.f32 %v464_v24, %v464_v24  ;;  %v277_v34 = vld [vmem:[%s1664_s29 + $0x458] sm:$0xff] }
  0xc1   : > { %v1325_v29 = vadd.f32 -1e-12, %v655_v23  ;;  %v657_v31 = vmul.f32 %v465_v25, %v465_v25  ;;  %1037 = vst [vmem:[%s1684_s16 + $0x418] sm:$0xff] %v1323_v26  ;;  %v467_v36 = vmax.f32 %v275_v32, 1e-06  ;;  %v278_v41 = vld [vmem:[%s1664_s29 + $0x460] sm:$0xff] }
  0xc2   : > { %1038 = vst [vmem:[%s1684_s16 + $0x420] sm:$0xff] %v1324_v27  ;;  %v658_v35 = vmul.f32 %v466_v28, %v466_v28  ;;  %v468_v37 = vmax.f32 %v276_v33, 1e-06  ;;  %v469_v38 = vmax.f32 %v277_v34, 1e-06  ;;  %v279_v42 = vld [vmem:[%s1664_s29 + $0x468] sm:$0xff] }
  0xc3   : > { %1039 = vst [vmem:[%s1684_s16 + $0x428] sm:$0xff] %v1325_v29  ;;  %v1326_v39 = vadd.f32 -1e-12, %v656_v30  ;;  %v1327_v40 = vadd.f32 -1e-12, %v657_v31  ;;  %v659_v44 = vmul.f32 %v467_v36, %v467_v36  ;;  %v280_v47 = vld [vmem:[%s1664_s29 + $0x470] sm:$0xff] }
  0xc4   : > { %v1328_v43 = vadd.f32 -1e-12, %v658_v35  ;;  %v660_v45 = vmul.f32 %v468_v37, %v468_v37  ;;  %v661_v46 = vmul.f32 %v469_v38, %v469_v38  ;;  %v281_v48 = vld [vmem:[%s1664_s29 + $0x478] sm:$0xff]  ;;  %v282_v49 = vld [vmem:[%s1664_s29 + $0x480] sm:$0xff]  ;;  %v470_v50 = vmax.f32 %v278_v41, 1e-06 }
  0xc5   : > { %1040 = vst [vmem:[%s1684_s16 + $0x430] sm:$0xff] %v1326_v39  ;;  %1041 = vst [vmem:[%s1684_s16 + $0x438] sm:$0xff] %v1327_v40  ;;  %v471_v51 = vmax.f32 %v279_v42, 1e-06  ;;  %v472_v52 = vmax.f32 %v280_v47, 1e-06 }
  0xc6   : > { %1042 = vst [vmem:[%s1684_s16 + $0x440] sm:$0xff] %v1328_v43  ;;  %v1329_v53 = vadd.f32 -1e-12, %v659_v44  ;;  %v1330_v54 = vadd.f32 -1e-12, %v660_v45  ;;  %v662_v56 = vmul.f32 %v470_v50, %v470_v50  ;;  %v283_v60 = vld [vmem:[%s1664_s29 + $0x488] sm:$0xff] }
  0xc7   : > { %v1331_v55 = vadd.f32 -1e-12, %v661_v46  ;;  %v663_v57 = vmul.f32 %v471_v51, %v471_v51  ;;  %v664_v58 = vmul.f32 %v472_v52, %v472_v52  ;;  %v473_v59 = vmax.f32 %v281_v48, 1e-06  ;;  %v284_v61 = vld [vmem:[%s1664_s29 + $0x490] sm:$0xff]  ;;  %v285_v62 = vld [vmem:[%s1664_s29 + $0x498] sm:$0xff] }
  0xc8   : > { %1043 = vst [vmem:[%s1684_s16 + $0x448] sm:$0xff] %v1329_v53  ;;  %1044 = vst [vmem:[%s1684_s16 + $0x450] sm:$0xff] %v1330_v54  ;;  %v474_v63 = vmax.f32 %v282_v49, 1e-06  ;;  %v475_v0 = vmax.f32 %v283_v60, 1e-06 }
  0xc9   : > { %1045 = vst [vmem:[%s1684_s16 + $0x458] sm:$0xff] %v1331_v55  ;;  %v476_v1 = vmax.f32 %v284_v61, 1e-06  ;;  %v1332_v2 = vadd.f32 -1e-12, %v662_v56  ;;  %v665_v5 = vmul.f32 %v473_v59, %v473_v59  ;;  %v286_v10 = vld [vmem:[%s1664_s29 + $0x4a0] sm:$0xff] }
  0xca   : > { %v1333_v3 = vadd.f32 -1e-12, %v663_v57  ;;  %v1334_v4 = vadd.f32 -1e-12, %v664_v58  ;;  %v666_v6 = vmul.f32 %v474_v63, %v474_v63  ;;  %v667_v7 = vmul.f32 %v475_v0, %v475_v0  ;;  %v287_v11 = vld [vmem:[%s1664_s29 + $0x4a8] sm:$0xff]  ;;  %v288_v12 = vld [vmem:[%s1664_s29 + $0x4b0] sm:$0xff] }
  0xcb   : > { %v668_v8 = vmul.f32 %v476_v1, %v476_v1  ;;  %v477_v9 = vmax.f32 %v285_v62, 1e-06  ;;  %1046 = vst [vmem:[%s1684_s16 + $0x460] sm:$0xff] %v1332_v2  ;;  %v1335_v13 = vadd.f32 -1e-12, %v665_v5  ;;  %v289_v23 = vld [vmem:[%s1664_s29 + $0x4b8] sm:$0xff] }
  0xcc   : > { %1047 = vst [vmem:[%s1684_s16 + $0x468] sm:$0xff] %v1333_v3  ;;  %1048 = vst [vmem:[%s1684_s16 + $0x470] sm:$0xff] %v1334_v4  ;;  %v478_v14 = vmax.f32 %v286_v10, 1e-06  ;;  %v479_v15 = vmax.f32 %v287_v11, 1e-06 }
  0xcd   : > { %v1336_v16 = vadd.f32 -1e-12, %v666_v6  ;;  %v1337_v17 = vadd.f32 -1e-12, %v667_v7  ;;  %v1338_v18 = vadd.f32 -1e-12, %v668_v8  ;;  %v669_v19 = vmul.f32 %v477_v9, %v477_v9 }
  0xce   : > { %1049 = vst [vmem:[%s1684_s16 + $0x478] sm:$0xff] %v1335_v13  ;;  %v670_v20 = vmul.f32 %v478_v14, %v478_v14  ;;  %v671_v21 = vmul.f32 %v479_v15, %v479_v15  ;;  %v480_v22 = vmax.f32 %v288_v12, 1e-06  ;;  %v290_v24 = vld [vmem:[%s1664_s29 + $0x4c0] sm:$0xff]  ;;  %v291_v25 = vld [vmem:[%s1664_s29 + $0x4c8] sm:$0xff]  ;;  %v292_v35 = vld [vmem:[%s1664_s29 + $0x4d0] sm:$0xff] }
  0xcf   : > { %1050 = vst [vmem:[%s1684_s16 + $0x480] sm:$0xff] %v1336_v16  ;;  %1051 = vst [vmem:[%s1684_s16 + $0x488] sm:$0xff] %v1337_v17  ;;  %v1339_v26 = vadd.f32 -1e-12, %v669_v19  ;;  %v481_v27 = vmax.f32 %v289_v23, 1e-06 }
  0xd0   : > { %1052 = vst [vmem:[%s1684_s16 + $0x490] sm:$0xff] %v1338_v18  ;;  %v482_v28 = vmax.f32 %v290_v24, 1e-06  ;;  %v1340_v29 = vadd.f32 -1e-12, %v670_v20  ;;  %v672_v31 = vmul.f32 %v480_v22, %v480_v22  ;;  %v293_v36 = vld [vmem:[%s1664_s29 + $0x4d8] sm:$0xff] }
  0xd1   : > { %v1341_v30 = vadd.f32 -1e-12, %v671_v21  ;;  %v483_v32 = vmax.f32 %v291_v25, 1e-06  ;;  %1053 = vst [vmem:[%s1684_s16 + $0x498] sm:$0xff] %v1339_v26  ;;  %v673_v33 = vmul.f32 %v481_v27, %v481_v27  ;;  %v294_v37 = vld [vmem:[%s1664_s29 + $0x4e0] sm:$0xff] }
  0xd2   : > { %v674_v34 = vmul.f32 %v482_v28, %v482_v28  ;;  %1054 = vst [vmem:[%s1684_s16 + $0x4a0] sm:$0xff] %v1340_v29  ;;  %v1342_v38 = vadd.f32 -1e-12, %v672_v31  ;;  %v484_v40 = vmax.f32 %v292_v35, 1e-06  ;;  %v295_v48 = vld [vmem:[%s1664_s29 + $0x4e8] sm:$0xff] }
  0xd3   : > { %1055 = vst [vmem:[%s1684_s16 + $0x4a8] sm:$0xff] %v1341_v30  ;;  %v675_v39 = vmul.f32 %v483_v32, %v483_v32  ;;  %v485_v41 = vmax.f32 %v293_v36, 1e-06  ;;  %v1343_v42 = vadd.f32 -1e-12, %v673_v33  ;;  %v296_v49 = vld [vmem:[%s1664_s29 + $0x4f0] sm:$0xff] }
  0xd4   : > { %v1344_v43 = vadd.f32 -1e-12, %v674_v34  ;;  %v486_v44 = vmax.f32 %v294_v37, 1e-06  ;;  %1056 = vst [vmem:[%s1684_s16 + $0x4b0] sm:$0xff] %v1342_v38  ;;  %v676_v46 = vmul.f32 %v484_v40, %v484_v40  ;;  %v297_v50 = vld [vmem:[%s1664_s29 + $0x4f8] sm:$0xff] }
  0xd5   : > { %v1345_v45 = vadd.f32 -1e-12, %v675_v39  ;;  %v677_v47 = vmul.f32 %v485_v41, %v485_v41  ;;  %1057 = vst [vmem:[%s1684_s16 + $0x4b8] sm:$0xff] %v1343_v42  ;;  %v487_v52 = vmax.f32 %v295_v48, 1e-06  ;;  %v298_v57 = vld [vmem:[%s1664_s29 + $0x500] sm:$0xff] }
  0xd6   : > { %1058 = vst [vmem:[%s1684_s16 + $0x4c0] sm:$0xff] %v1344_v43  ;;  %v678_v51 = vmul.f32 %v486_v44, %v486_v44  ;;  %v488_v53 = vmax.f32 %v296_v49, 1e-06  ;;  %v489_v54 = vmax.f32 %v297_v50, 1e-06  ;;  %v299_v58 = vld [vmem:[%s1664_s29 + $0x508] sm:$0xff] }
  0xd7   : > { %1059 = vst [vmem:[%s1684_s16 + $0x4c8] sm:$0xff] %v1345_v45  ;;  %v1346_v55 = vadd.f32 -1e-12, %v676_v46  ;;  %v1347_v56 = vadd.f32 -1e-12, %v677_v47  ;;  %v679_v60 = vmul.f32 %v487_v52, %v487_v52  ;;  %v300_v63 = vld [vmem:[%s1664_s29 + $0x510] sm:$0xff] }
  0xd8   : > { %v1348_v59 = vadd.f32 -1e-12, %v678_v51  ;;  %v680_v61 = vmul.f32 %v488_v53, %v488_v53  ;;  %v681_v62 = vmul.f32 %v489_v54, %v489_v54  ;;  %v301_v0 = vld [vmem:[%s1664_s29 + $0x518] sm:$0xff]  ;;  %v302_v1 = vld [vmem:[%s1664_s29 + $0x520] sm:$0xff]  ;;  %v490_v2 = vmax.f32 %v298_v57, 1e-06 }
  0xd9   : > { %1060 = vst [vmem:[%s1684_s16 + $0x4d0] sm:$0xff] %v1346_v55  ;;  %1061 = vst [vmem:[%s1684_s16 + $0x4d8] sm:$0xff] %v1347_v56  ;;  %v491_v3 = vmax.f32 %v299_v58, 1e-06  ;;  %v492_v4 = vmax.f32 %v300_v63, 1e-06 }
  0xda   : > { %1062 = vst [vmem:[%s1684_s16 + $0x4e0] sm:$0xff] %v1348_v59  ;;  %v1349_v5 = vadd.f32 -1e-12, %v679_v60  ;;  %v1350_v6 = vadd.f32 -1e-12, %v680_v61  ;;  %v682_v8 = vmul.f32 %v490_v2, %v490_v2  ;;  %v303_v12 = vld [vmem:[%s1664_s29 + $0x528] sm:$0xff] }
  0xdb   : > { %v1351_v7 = vadd.f32 -1e-12, %v681_v62  ;;  %v683_v9 = vmul.f32 %v491_v3, %v491_v3  ;;  %v684_v10 = vmul.f32 %v492_v4, %v492_v4  ;;  %v493_v11 = vmax.f32 %v301_v0, 1e-06  ;;  %v304_v13 = vld [vmem:[%s1664_s29 + $0x530] sm:$0xff]  ;;  %v305_v14 = vld [vmem:[%s1664_s29 + $0x538] sm:$0xff] }
  0xdc   : > { %1063 = vst [vmem:[%s1684_s16 + $0x4e8] sm:$0xff] %v1349_v5  ;;  %1064 = vst [vmem:[%s1684_s16 + $0x4f0] sm:$0xff] %v1350_v6  ;;  %v494_v15 = vmax.f32 %v302_v1, 1e-06  ;;  %v495_v16 = vmax.f32 %v303_v12, 1e-06 }
  0xdd   : > { %1065 = vst [vmem:[%s1684_s16 + $0x4f8] sm:$0xff] %v1351_v7  ;;  %v496_v17 = vmax.f32 %v304_v13, 1e-06  ;;  %v1352_v18 = vadd.f32 -1e-12, %v682_v8  ;;  %v685_v21 = vmul.f32 %v493_v11, %v493_v11  ;;  %v306_v26 = vld [vmem:[%s1664_s29 + $0x540] sm:$0xff] }
  0xde   : > { %v1353_v19 = vadd.f32 -1e-12, %v683_v9  ;;  %v1354_v20 = vadd.f32 -1e-12, %v684_v10  ;;  %v686_v22 = vmul.f32 %v494_v15, %v494_v15  ;;  %v687_v23 = vmul.f32 %v495_v16, %v495_v16  ;;  %v307_v27 = vld [vmem:[%s1664_s29 + $0x548] sm:$0xff]  ;;  %v308_v28 = vld [vmem:[%s1664_s29 + $0x550] sm:$0xff] }
  0xdf   : > { %v688_v24 = vmul.f32 %v496_v17, %v496_v17  ;;  %v497_v25 = vmax.f32 %v305_v14, 1e-06  ;;  %1066 = vst [vmem:[%s1684_s16 + $0x500] sm:$0xff] %v1352_v18  ;;  %v1355_v29 = vadd.f32 -1e-12, %v685_v21  ;;  %v309_v39 = vld [vmem:[%s1664_s29 + $0x558] sm:$0xff] }
  0xe0   : > { %1067 = vst [vmem:[%s1684_s16 + $0x508] sm:$0xff] %v1353_v19  ;;  %1068 = vst [vmem:[%s1684_s16 + $0x510] sm:$0xff] %v1354_v20  ;;  %v498_v30 = vmax.f32 %v306_v26, 1e-06  ;;  %v499_v31 = vmax.f32 %v307_v27, 1e-06 }
  0xe1   : > { %v1356_v32 = vadd.f32 -1e-12, %v686_v22  ;;  %v1357_v33 = vadd.f32 -1e-12, %v687_v23  ;;  %v1358_v34 = vadd.f32 -1e-12, %v688_v24  ;;  %v689_v35 = vmul.f32 %v497_v25, %v497_v25 }
  0xe2   : > { %1069 = vst [vmem:[%s1684_s16 + $0x518] sm:$0xff] %v1355_v29  ;;  %v690_v36 = vmul.f32 %v498_v30, %v498_v30  ;;  %v691_v37 = vmul.f32 %v499_v31, %v499_v31  ;;  %v500_v38 = vmax.f32 %v308_v28, 1e-06  ;;  %v310_v40 = vld [vmem:[%s1664_s29 + $0x560] sm:$0xff]  ;;  %v311_v41 = vld [vmem:[%s1664_s29 + $0x568] sm:$0xff]  ;;  %v312_v51 = vld [vmem:[%s1664_s29 + $0x570] sm:$0xff] }
  0xe3   : > { %1070 = vst [vmem:[%s1684_s16 + $0x520] sm:$0xff] %v1356_v32  ;;  %1071 = vst [vmem:[%s1684_s16 + $0x528] sm:$0xff] %v1357_v33  ;;  %v1359_v42 = vadd.f32 -1e-12, %v689_v35  ;;  %v501_v43 = vmax.f32 %v309_v39, 1e-06 }
  0xe4   : > { %1072 = vst [vmem:[%s1684_s16 + $0x530] sm:$0xff] %v1358_v34  ;;  %v502_v44 = vmax.f32 %v310_v40, 1e-06  ;;  %v1360_v45 = vadd.f32 -1e-12, %v690_v36  ;;  %v692_v47 = vmul.f32 %v500_v38, %v500_v38  ;;  %v313_v52 = vld [vmem:[%s1664_s29 + $0x578] sm:$0xff] }
  0xe5   : > { %v1361_v46 = vadd.f32 -1e-12, %v691_v37  ;;  %v503_v48 = vmax.f32 %v311_v41, 1e-06  ;;  %1073 = vst [vmem:[%s1684_s16 + $0x538] sm:$0xff] %v1359_v42  ;;  %v693_v49 = vmul.f32 %v501_v43, %v501_v43  ;;  %v314_v53 = vld [vmem:[%s1664_s29 + $0x580] sm:$0xff] }
  0xe6   : > { %v694_v50 = vmul.f32 %v502_v44, %v502_v44  ;;  %1074 = vst [vmem:[%s1684_s16 + $0x540] sm:$0xff] %v1360_v45  ;;  %v1362_v54 = vadd.f32 -1e-12, %v692_v47  ;;  %v504_v56 = vmax.f32 %v312_v51, 1e-06  ;;  %v315_v0 = vld [vmem:[%s1664_s29 + $0x588] sm:$0xff] }
  0xe7   : > { %1075 = vst [vmem:[%s1684_s16 + $0x548] sm:$0xff] %v1361_v46  ;;  %v695_v55 = vmul.f32 %v503_v48, %v503_v48  ;;  %v505_v57 = vmax.f32 %v313_v52, 1e-06  ;;  %v1363_v58 = vadd.f32 -1e-12, %v693_v49  ;;  %v316_v1 = vld [vmem:[%s1664_s29 + $0x590] sm:$0xff] }
  0xe8   : > { %v1364_v59 = vadd.f32 -1e-12, %v694_v50  ;;  %v506_v60 = vmax.f32 %v314_v53, 1e-06  ;;  %1076 = vst [vmem:[%s1684_s16 + $0x550] sm:$0xff] %v1362_v54  ;;  %v696_v62 = vmul.f32 %v504_v56, %v504_v56  ;;  %v317_v2 = vld [vmem:[%s1664_s29 + $0x598] sm:$0xff] }
  0xe9   : > { %v1365_v61 = vadd.f32 -1e-12, %v695_v55  ;;  %v697_v63 = vmul.f32 %v505_v57, %v505_v57  ;;  %1077 = vst [vmem:[%s1684_s16 + $0x558] sm:$0xff] %v1363_v58  ;;  %v507_v4 = vmax.f32 %v315_v0, 1e-06  ;;  %v318_v9 = vld [vmem:[%s1664_s29 + $0x5a0] sm:$0xff] }
  0xea   : > { %1078 = vst [vmem:[%s1684_s16 + $0x560] sm:$0xff] %v1364_v59  ;;  %v698_v3 = vmul.f32 %v506_v60, %v506_v60  ;;  %v508_v5 = vmax.f32 %v316_v1, 1e-06  ;;  %v509_v6 = vmax.f32 %v317_v2, 1e-06  ;;  %v319_v10 = vld [vmem:[%s1664_s29 + $0x5a8] sm:$0xff] }
  0xeb   : > { %1079 = vst [vmem:[%s1684_s16 + $0x568] sm:$0xff] %v1365_v61  ;;  %v1366_v7 = vadd.f32 -1e-12, %v696_v62  ;;  %v1367_v8 = vadd.f32 -1e-12, %v697_v63  ;;  %v699_v12 = vmul.f32 %v507_v4, %v507_v4  ;;  %v320_v15 = vld [vmem:[%s1664_s29 + $0x5b0] sm:$0xff] }
  0xec   : > { %v1368_v11 = vadd.f32 -1e-12, %v698_v3  ;;  %v700_v13 = vmul.f32 %v508_v5, %v508_v5  ;;  %v701_v14 = vmul.f32 %v509_v6, %v509_v6  ;;  %v321_v16 = vld [vmem:[%s1664_s29 + $0x5b8] sm:$0xff]  ;;  %v322_v17 = vld [vmem:[%s1664_s29 + $0x5c0] sm:$0xff]  ;;  %v510_v18 = vmax.f32 %v318_v9, 1e-06 }
  0xed   : > { %1080 = vst [vmem:[%s1684_s16 + $0x570] sm:$0xff] %v1366_v7  ;;  %1081 = vst [vmem:[%s1684_s16 + $0x578] sm:$0xff] %v1367_v8  ;;  %v511_v19 = vmax.f32 %v319_v10, 1e-06  ;;  %v512_v20 = vmax.f32 %v320_v15, 1e-06 }
  0xee   : > { %1082 = vst [vmem:[%s1684_s16 + $0x580] sm:$0xff] %v1368_v11  ;;  %v1369_v21 = vadd.f32 -1e-12, %v699_v12  ;;  %v1370_v22 = vadd.f32 -1e-12, %v700_v13  ;;  %v702_v24 = vmul.f32 %v510_v18, %v510_v18  ;;  %v323_v28 = vld [vmem:[%s1664_s29 + $0x5c8] sm:$0xff] }
  0xef   : > { %v1371_v23 = vadd.f32 -1e-12, %v701_v14  ;;  %v703_v25 = vmul.f32 %v511_v19, %v511_v19  ;;  %v704_v26 = vmul.f32 %v512_v20, %v512_v20  ;;  %v513_v27 = vmax.f32 %v321_v16, 1e-06  ;;  %v324_v29 = vld [vmem:[%s1664_s29 + $0x5d0] sm:$0xff]  ;;  %v325_v30 = vld [vmem:[%s1664_s29 + $0x5d8] sm:$0xff] }
  0xf0   : > { %1083 = vst [vmem:[%s1684_s16 + $0x588] sm:$0xff] %v1369_v21  ;;  %1084 = vst [vmem:[%s1684_s16 + $0x590] sm:$0xff] %v1370_v22  ;;  %v514_v31 = vmax.f32 %v322_v17, 1e-06  ;;  %v515_v32 = vmax.f32 %v323_v28, 1e-06 }
  0xf1   : > { %1085 = vst [vmem:[%s1684_s16 + $0x598] sm:$0xff] %v1371_v23  ;;  %v516_v33 = vmax.f32 %v324_v29, 1e-06  ;;  %v1372_v34 = vadd.f32 -1e-12, %v702_v24  ;;  %v705_v37 = vmul.f32 %v513_v27, %v513_v27  ;;  %v326_v42 = vld [vmem:[%s1664_s29 + $0x5e0] sm:$0xff] }
  0xf2   : > { %v1373_v35 = vadd.f32 -1e-12, %v703_v25  ;;  %v1374_v36 = vadd.f32 -1e-12, %v704_v26  ;;  %v706_v38 = vmul.f32 %v514_v31, %v514_v31  ;;  %v707_v39 = vmul.f32 %v515_v32, %v515_v32  ;;  %v327_v43 = vld [vmem:[%s1664_s29 + $0x5e8] sm:$0xff]  ;;  %v328_v44 = vld [vmem:[%s1664_s29 + $0x5f0] sm:$0xff] }
  0xf3   : > { %v708_v40 = vmul.f32 %v516_v33, %v516_v33  ;;  %v517_v41 = vmax.f32 %v325_v30, 1e-06  ;;  %1086 = vst [vmem:[%s1684_s16 + $0x5a0] sm:$0xff] %v1372_v34  ;;  %v1375_v45 = vadd.f32 -1e-12, %v705_v37  ;;  %v329_v55 = vld [vmem:[%s1664_s29 + $0x5f8] sm:$0xff] }
  0xf4   : > { %1087 = vst [vmem:[%s1684_s16 + $0x5a8] sm:$0xff] %v1373_v35  ;;  %1088 = vst [vmem:[%s1684_s16 + $0x5b0] sm:$0xff] %v1374_v36  ;;  %v518_v46 = vmax.f32 %v326_v42, 1e-06  ;;  %v519_v47 = vmax.f32 %v327_v43, 1e-06 }
  0xf5   : > { %v1376_v48 = vadd.f32 -1e-12, %v706_v38  ;;  %v1377_v49 = vadd.f32 -1e-12, %v707_v39  ;;  %v1378_v50 = vadd.f32 -1e-12, %v708_v40  ;;  %v709_v51 = vmul.f32 %v517_v41, %v517_v41 }
  0xf6   : > { %1089 = vst [vmem:[%s1684_s16 + $0x5b8] sm:$0xff] %v1375_v45  ;;  %v710_v52 = vmul.f32 %v518_v46, %v518_v46  ;;  %v711_v53 = vmul.f32 %v519_v47, %v519_v47  ;;  %v520_v54 = vmax.f32 %v328_v44, 1e-06  ;;  %v521_v57 = vmax.f32 %v329_v55, 1e-06 }
  0xf7   : > { %1090 = vst [vmem:[%s1684_s16 + $0x5c0] sm:$0xff] %v1376_v48  ;;  %1091 = vst [vmem:[%s1684_s16 + $0x5c8] sm:$0xff] %v1377_v49  ;;  %v1379_v56 = vadd.f32 -1e-12, %v709_v51 }
  0xf8   : > { %1092 = vst [vmem:[%s1684_s16 + $0x5d0] sm:$0xff] %v1378_v50  ;;  %v1380_v58 = vadd.f32 -1e-12, %v710_v52  ;;  %v1381_v59 = vadd.f32 -1e-12, %v711_v53  ;;  %v712_v60 = vmul.f32 %v520_v54, %v520_v54  ;;  %v713_v61 = vmul.f32 %v521_v57, %v521_v57 }
  0xf9   : > { %1093 = vst [vmem:[%s1684_s16 + $0x5d8] sm:$0xff] %v1379_v56 }
  0xfa   : > { %1094 = vst [vmem:[%s1684_s16 + $0x5e0] sm:$0xff] %v1380_v58  ;;  %1095 = vst [vmem:[%s1684_s16 + $0x5e8] sm:$0xff] %v1381_v59  ;;  %v1382_v62 = vadd.f32 -1e-12, %v712_v60  ;;  %v1383_v63 = vadd.f32 -1e-12, %v713_v61 }
  0xfc   : > { %1096 = vst [vmem:[%s1684_s16 + $0x5f0] sm:$0xff] %v1382_v62  ;;  %1097 = vst [vmem:[%s1684_s16 + $0x5f8] sm:$0xff] %v1383_v63 }
  0xfd   : > { %1489 = shalt.err (!%p1486_p2)
}
  0xfe   : > { %s1490_s11 = scalar_lea.hbm %s2059_s28, 24576  ;;  %s1494_s19 = scalar_lea.hbm %s2110_s1, 49152 }
  0xff   : > { %p1491_p4 = scmp.ne.s32.totalorder %s2059_s28, %s1490_s11  ;;  %p1495_p9 = scmp.lt.u32.totalorder %s2059_s28, %s2110_s1 }
 0x100   : > { %p1496_p1 = scmp.lt.u32.totalorder %s1494_s19, %s1490_s11  ;;  %p1498_p6 = scmp.lt.u32.totalorder %s1490_s11, %s2059_s28 }
 0x101   : > { %p1492_p5 = pnand %p1491_p4, %p2116_p11 }
 0x102   : > { %p1497_p3 = por %p1496_p1, %p1495_p9 }
 0x103   : > { %p1493_p7 = pneg %p1492_p5 }
 0x104   : > { %p1499_p12 = por %p1498_p6, %p1497_p3 }
 0x106   : > { %p1500_p13 = pnand %p1499_p12, %p1493_p7 }
 0x108   : > { %1503 = shalt.err (!%p1500_p13)
}
 0x109   : > { %s1548_s23 = smov 4096   ;;  %s1549_s26 = smov 256  }
 0x10a   : > { %1398 = dma.vmem_to_hbm [thread:$0]  (%p2116_p11), %s2063_s10, 24576, %s2059_s28, %s1099_s30, %s1548_s23, %s1548_s23, %s1549_s26  }
 0x10b PF: > { %s1128_s29 = sand.u32 1, %s1530_s6   ;;  %p2117_p8 = scmp.ne.s32.totalorder %s2114_s18, 0 }
 0x10c   : > { %p2118_p10 = scmp.ge.s32.totalorder %s1542_s9, 2  ;;  %s1129_s16 = scalar_lea.sflag [#allocation4], %s1128_s29 }
 0x10e   : > { %p1405_p0 = pnand %p2118_p10, %p2117_p8 }
 0x110   : > { %1525 = dma.done.wait (!%p1405_p0), %s1129_s16, 24576  }
 0x111   : > { %1527 = vsyncadd (!%p1405_p0), %s1129_s16, 4294942720  ;;  %p14_p2 = scmp.ge.s32.totalorder %s1585_s12, 4   ;;  %s2119_s6 = smov %s1534_s7 }
 0x112   : > { %s2120_s7 = smov %s1538_s8  ;;  %s2121_s8 = smov %s1597_s15 }
 0x113   : > { %s2122_s9 = smov %s1585_s12  ;;  %16 = sbr.rel (!%p14_p2) target bundleno = 5 (0x5), region = 69 }
 0x11a   :  { %1134 = vsyncpa [#allocation3], 1 }
 0x11b   :  { %1136 = vsyncpa [#allocation3 + $0x1], 1 }
 0x11c   :  { %1137 = vsyncpa [#allocation4], 1 }
 0x11d   :  { %1139 = vsyncpa [#allocation4 + $0x1], 1 }

</bundles_post_ra>
